<compile_context>
chip_gen: v7x
topology: tpu7x:2x2x1
jax: 0.10.0
libtpu: 0.0.40
codegen_flags: <defaults>
</compile_context>

<pallas_src>
import functools

import jax
import jax.numpy as jnp
from jax.experimental import pallas as pl
from jax.experimental.pallas import tpu as pltpu

HIDDEN = 128
VMEM_TB_CAP = 2048          # keeps double-buffered blocks + intermediates well inside scoped VMEM


def _actor_critic_kernel(x_ref, w1_ref, b1_ref, w2_ref, b2_ref, wh_ref, bh_ref,
                         pol_ref, val_ref, *, output_dim, fuse_l2):
    # x:  [TB, in] f32   w1: [in, 2H] bf16   b1: [1, 2H] f32
    # w2: [2H, 2H] bf16 (fused) or [2, H, H] bf16 (split)   b2: [1, 2H] f32
    # wh: [2H, OUT_PAD] bf16   bh: [1, OUT_PAD] f32
    # pol: [TB, OUT_PAD] bf16   val: [TB, 1] f32
    x = x_ref[...].astype(jnp.bfloat16)            # in-kernel cast (rides VPU slack)

    # ---- layer 1: actor | critic fused along N ----
    h1 = jnp.dot(x, w1_ref[...], preferred_element_type=jnp.float32) + b1_ref[...]
    h1 = jnp.maximum(h1, 0.0).astype(jnp.bfloat16)                      # [TB, 2H]

    wh = wh_ref[...]
    b2 = b2_ref[...]

    # ---- layer 2 + fused heads ----
    if fuse_l2:
        # block-diagonal [2H, 2H]: one push on the 256-wide MXU (v6e, memory-bound)
        h2 = jnp.dot(h1, w2_ref[...], preferred_element_type=jnp.float32) + b2
        h2 = jnp.maximum(h2, 0.0).astype(jnp.bfloat16)                  # [TB, 2H]
        heads = jnp.dot(h2, wh, preferred_element_type=jnp.float32) + bh_ref[...]
    else:
        # v5e / v7x: two 128x128 matmuls, concat-free; heads accumulated as two K=128 dots
        a2 = jnp.dot(h1[:, :HIDDEN], w2_ref[0],
                     preferred_element_type=jnp.float32) + b2[:, :HIDDEN]
        c2 = jnp.dot(h1[:, HIDDEN:], w2_ref[1],
                     preferred_element_type=jnp.float32) + b2[:, HIDDEN:]
        a2 = jnp.maximum(a2, 0.0).astype(jnp.bfloat16)
        c2 = jnp.maximum(c2, 0.0).astype(jnp.bfloat16)
        heads = (jnp.dot(a2, wh[:HIDDEN], preferred_element_type=jnp.float32)
                 + jnp.dot(c2, wh[HIDDEN:], preferred_element_type=jnp.float32)
                 + bh_ref[...])                                         # [TB, OUT_PAD]

    # ---- masked softmax over the policy lanes (mask is (1, OUT_PAD), broadcast) ----
    out_pad = heads.shape[-1]
    lane = jax.lax.broadcasted_iota(jnp.int32, (1, out_pad), 1)
    is_policy = lane < output_dim
    logits = jnp.where(is_policy, heads, -1e30)
    m = jnp.max(logits, axis=-1, keepdims=True)
    e = jnp.where(is_policy, jnp.exp(logits - m), 0.0)
    denom = jnp.sum(e, axis=-1, keepdims=True)
    inv = pl.reciprocal(denom, approx=True)
    inv = inv * (2.0 - denom * inv)                 # one Newton step: near-exact, still VPU-cheap
    policy = e * inv                                # zero outside the policy lanes

    pol_ref[...] = policy.astype(pol_ref.dtype)                     # bf16 lane-dense slab
    val_ref[...] = heads[:, output_dim:output_dim + 1]              # f32 value column


def _device_kind():
    try:
        return jax.devices()[0].device_kind.lower()
    except Exception:
        return ""


def _num_tensorcores():
    # v7x exposes 2 TensorCores per chip; the "parallel" batch axis shards across them.
    return 2 if "v7" in _device_kind() else 1


def _device_prefers_fused_l2():
    """Zero-block fused layer-2 only pays off where the kernel stays memory-bound (v6e)."""
    kind = _device_kind()
    if not kind:
        return True
    if "v5 lite" in kind or "v5e" in kind or "v5litepod" in kind:
        return False     # 128x128 MXUs: don't multiply zero blocks
    if "v7" in kind:
        return False     # fast HBM can make the zero-block FLOPs the critical path
    return True          # v6e & unknown: one 256-wide MXU pass, memory-bound anyway


def _pack_params(p, output_dim, fuse_l2):
    """Fuse/pad the per-network weights into the kernel's packed layout."""
    H = HIDDEN
    w1 = jnp.concatenate([p["aw1"], p["cw1"]], axis=1).astype(jnp.bfloat16)   # [in, 2H]
    b1 = jnp.concatenate([p["ab1"], p["cb1"]], axis=1).astype(jnp.float32)    # [1, 2H]

    if fuse_l2:
        z = jnp.zeros((H, H), jnp.float32)
        w2 = jnp.block([[p["aw2"], z], [z, p["cw2"]]]).astype(jnp.bfloat16)   # [2H, 2H]
    else:
        w2 = jnp.stack([p["aw2"], p["cw2"]], axis=0).astype(jnp.bfloat16)     # [2, H, H]
    b2 = jnp.concatenate([p["ab2"], p["cb2"]], axis=1).astype(jnp.float32)    # [1, 2H]

    out_pad = 128 * ((output_dim + 1 + 127) // 128)                           # lane-dense head width
    wh = jnp.zeros((2 * H, out_pad), jnp.float32)
    wh = wh.at[:H, :output_dim].set(p["pw"])
    wh = wh.at[H:, output_dim].set(p["vw"][:, 0])
    wh = wh.astype(jnp.bfloat16)
    bh = jnp.zeros((1, out_pad), jnp.float32)
    bh = bh.at[0, :output_dim].set(p["pb"][0])
    bh = bh.at[0, output_dim].set(p["vb"][0, 0])
    return w1, b1, w2, b2, wh, bh, out_pad


def _const_spec(arr):
    nd = arr.ndim
    return pl.BlockSpec(arr.shape, lambda i: (0,) * nd)   # weights: DMA'd once, VMEM-resident


def _choose_tile(B, block_b, n_cores):
    tb = max(8, min(block_b, VMEM_TB_CAP, B))
    tb = ((tb + 7) // 8) * 8
    if n_cores > 1:
        # keep at least n_cores grid steps so the batch axis shards across all TensorCores
        per_core = max(8, ((-(-B // n_cores) + 7) // 8) * 8)
        tb = min(tb, per_core)
    bp = -(-B // tb) * tb
    return tb, bp


def actor_critic_forward(x, params, *, block_b=1024, fuse_l2=None):
    """x: [B, input_dim] float32.  params: dict of f32 weights [in, out] and biases [1, out].

    Returns (policy [B, output_dim] bf16, value [B, 1] f32).
    """
    if fuse_l2 is None:
        fuse_l2 = _device_prefers_fused_l2()
    output_dim = params["pw"].shape[1]
    B, input_dim = x.shape

    w1, b1, w2, b2, wh, bh, out_pad = _pack_params(params, output_dim, fuse_l2)

    tb, bp = _choose_tile(B, block_b, _num_tensorcores())
    if bp != B:
        x = jnp.pad(x, ((0, bp - B), (0, 0)))       # only when tb does not divide B

    kernel = functools.partial(_actor_critic_kernel,
                               output_dim=output_dim, fuse_l2=fuse_l2)

    policy_pad, value_pad = pl.pallas_call(
        kernel,
        out_shape=(jax.ShapeDtypeStruct((bp, out_pad), jnp.bfloat16),
                   jax.ShapeDtypeStruct((bp, 1), jnp.float32)),
        grid=(bp // tb,),
        in_specs=[
            pl.BlockSpec((tb, input_dim), lambda i: (i, 0)),   # x: f32, tiled over batch
            _const_spec(w1), _const_spec(b1),
            _const_spec(w2), _const_spec(b2),
            _const_spec(wh), _const_spec(bh),
        ],
        out_specs=(pl.BlockSpec((tb, out_pad), lambda i: (i, 0)),
                   pl.BlockSpec((tb, 1), lambda i: (i, 0))),
        compiler_params=pltpu.CompilerParams(
            dimension_semantics=("parallel",),
            vmem_limit_bytes=32 * 1024 * 1024),
    )(x, w1, b1, w2, b2, wh, bh)

    policy = policy_pad[:B, :output_dim]
    value = value_pad[:B]
    return policy, value


def init_params(key, input_dim, output_dim, hidden=HIDDEN):
    """nn.Linear-style init (uniform +/- 1/sqrt(fan_in)); weights stored as [in, out], biases [1, out]."""
    def linear(key, fan_in, fan_out):
        kw, kb = jax.random.split(key)
        bound = 1.0 / jnp.sqrt(jnp.float32(fan_in))
        w = jax.random.uniform(kw, (fan_in, fan_out), jnp.float32, -bound, bound)
        b = jax.random.uniform(kb, (1, fan_out), jnp.float32, -bound, bound)
        return w, b

    keys = jax.random.split(key, 6)
    aw1, ab1 = linear(keys[0], input_dim, hidden)
    aw2, ab2 = linear(keys[1], hidden, hidden)
    cw1, cb1 = linear(keys[2], input_dim, hidden)
    cw2, cb2 = linear(keys[3], hidden, hidden)
    pw, pb = linear(keys[4], hidden, output_dim)
    vw, vb = linear(keys[5], hidden, 1)
    return dict(aw1=aw1, ab1=ab1, aw2=aw2, ab2=ab2,
                cw1=cw1, cb1=cb1, cw2=cw2, cb2=cb2,
                pw=pw, pb=pb, vw=vw, vb=vb)


def reference_forward(x, p):
    """Pure-JAX f32 reference of the PyTorch module semantics."""
    a = jnp.maximum(x @ p["aw1"] + p["ab1"], 0.0)
    a = jnp.maximum(a @ p["aw2"] + p["ab2"], 0.0)
    c = jnp.maximum(x @ p["cw1"] + p["cb1"], 0.0)
    c = jnp.maximum(c @ p["cw2"] + p["cb2"], 0.0)
    policy = jax.nn.softmax(a @ p["pw"] + p["pb"], axis=-1)
    value = c @ p["vw"] + p["vb"]
    return policy, value


def _check(policy, value, ref_policy, ref_value, batch, output_dim):
    assert policy.shape == (batch, output_dim)
    assert value.shape == (batch, 1)
    p32 = policy.astype(jnp.float32)
    # policy is stored as bf16 -> sum-to-1 tolerance loosened accordingly
    assert jnp.allclose(jnp.sum(p32, axis=-1), 1.0, atol=5e-3)
    # bf16 MXU inputs with f32 accumulation -> loose tolerance vs the f32 reference
    assert jnp.allclose(p32, ref_policy, atol=3e-2, rtol=3e-2)
    assert jnp.allclose(value, ref_value, atol=5e-2, rtol=5e-2)


if __name__ == "__main__":
    key = jax.random.PRNGKey(0)
    k_params, k_x = jax.random.split(key)

    batch = 250          # not a multiple of 8 -> exercises the batch-padding path
    input_dim = 32
    output_dim = 8

    params = init_params(k_params, input_dim, output_dim)
    x = jax.random.normal(k_x, (batch, input_dim), jnp.float32)

    ref_policy, ref_value = reference_forward(x, params)

    # 1) default large-tile path + fused block-diagonal layer 2
    policy, value = actor_critic_forward(x, params, fuse_l2=True)
    policy, value = jax.block_until_ready((policy, value))
    _check(policy, value, ref_policy, ref_value, batch, output_dim)

    # 2) small-tile multi-step grid + concat-free split layer-2 path
    policy2, value2 = actor_critic_forward(x, params, block_b=64, fuse_l2=False)
    policy2, value2 = jax.block_until_ready((policy2, value2))
    _check(policy2, value2, ref_policy, ref_value, batch, output_dim)

    print("KERNEL_OK")
</pallas_src>

<mosaic_0001>
module attributes {stable_mosaic.version = 11 : i64} {
  func.func @_actor_critic_kernel(%arg0: i32, %arg1: memref<256x32xf32, #tpu.memory_space<vmem>>, %arg2: memref<32x256xbf16, #tpu.memory_space<vmem>>, %arg3: memref<1x256xf32, #tpu.memory_space<vmem>>, %arg4: memref<256x256xbf16, #tpu.memory_space<vmem>>, %arg5: memref<1x256xf32, #tpu.memory_space<vmem>>, %arg6: memref<256x128xbf16, #tpu.memory_space<vmem>>, %arg7: memref<1x128xf32, #tpu.memory_space<vmem>>, %arg8: memref<256x128xbf16, #tpu.memory_space<vmem>>, %arg9: memref<256x1xf32, #tpu.memory_space<vmem>>) attributes {dimension_semantics = [#tpu.dimension_semantics<parallel>], iteration_bounds = array<i64: 1>, scalar_prefetch = 0 : i64, scratch_operands = 0 : i64, tpu.core_type = #tpu.core_type<tc>, window_params = [{transform_indices = @transform_0, window_bounds = array<i64: 256, 32>}, {pipeline_mode = #tpu.pipeline_mode<synchronous>, transform_indices = @transform_1, window_bounds = array<i64: 32, 256>}, {pipeline_mode = #tpu.pipeline_mode<synchronous>, transform_indices = @transform_2, window_bounds = array<i64: 1, 256>}, {pipeline_mode = #tpu.pipeline_mode<synchronous>, transform_indices = @transform_3, window_bounds = array<i64: 256, 256>}, {pipeline_mode = #tpu.pipeline_mode<synchronous>, transform_indices = @transform_4, window_bounds = array<i64: 1, 256>}, {pipeline_mode = #tpu.pipeline_mode<synchronous>, transform_indices = @transform_5, window_bounds = array<i64: 256, 128>}, {pipeline_mode = #tpu.pipeline_mode<synchronous>, transform_indices = @transform_6, window_bounds = array<i64: 1, 128>}, {transform_indices = @transform_7, window_bounds = array<i64: 256, 128>}, {transform_indices = @transform_8, window_bounds = array<i64: 256, 1>}]} {
    %c0 = arith.constant 0 : index
    %c0_0 = arith.constant 0 : index
    %0 = vector.load %arg1[%c0, %c0_0] : memref<256x32xf32, #tpu.memory_space<vmem>>, vector<256x32xf32>
    %1 = arith.truncf %0 : vector<256x32xf32> to vector<256x32xbf16>
    %c0_1 = arith.constant 0 : index
    %c0_2 = arith.constant 0 : index
    %2 = vector.load %arg2[%c0_1, %c0_2] : memref<32x256xbf16, #tpu.memory_space<vmem>>, vector<32x256xbf16>
    %cst = arith.constant dense<0.000000e+00> : vector<256x256xf32>
    %3 = tpu.matmul %1, %2, %cst {dimension_numbers = #tpu.dot_dimension_numbers<[1], [0], [0], [1], [0, 0, 1, 1], [], []>} : vector<256x32xbf16>, vector<32x256xbf16>, vector<256x256xf32> -> vector<256x256xf32>
    %c0_3 = arith.constant 0 : index
    %c0_4 = arith.constant 0 : index
    %4 = vector.load %arg3[%c0_3, %c0_4] : memref<1x256xf32, #tpu.memory_space<vmem>>, vector<1x256xf32>
    %5 = vector.broadcast %4 : vector<1x256xf32> to vector<256x256xf32>
    %6 = arith.addf %3, %5 : vector<256x256xf32>
    %cst_5 = arith.constant 0.000000e+00 : f32
    %7 = vector.broadcast %cst_5 : f32 to vector<256x256xf32>
    %8 = arith.maximumf %6, %7 : vector<256x256xf32>
    %9 = arith.truncf %8 : vector<256x256xf32> to vector<256x256xbf16>
    %c0_6 = arith.constant 0 : index
    %c0_7 = arith.constant 0 : index
    %10 = vector.load %arg6[%c0_6, %c0_7] : memref<256x128xbf16, #tpu.memory_space<vmem>>, vector<256x128xbf16>
    %c0_8 = arith.constant 0 : index
    %c0_9 = arith.constant 0 : index
    %11 = vector.load %arg5[%c0_8, %c0_9] : memref<1x256xf32, #tpu.memory_space<vmem>>, vector<1x256xf32>
    %c0_10 = arith.constant 0 : index
    %c0_11 = arith.constant 0 : index
    %12 = vector.load %arg4[%c0_10, %c0_11] : memref<256x256xbf16, #tpu.memory_space<vmem>>, vector<256x256xbf16>
    %cst_12 = arith.constant dense<0.000000e+00> : vector<256x256xf32>
    %13 = tpu.matmul %9, %12, %cst_12 {dimension_numbers = #tpu.dot_dimension_numbers<[1], [0], [0], [1], [0, 0, 1, 1], [], []>} : vector<256x256xbf16>, vector<256x256xbf16>, vector<256x256xf32> -> vector<256x256xf32>
    %14 = vector.broadcast %11 : vector<1x256xf32> to vector<256x256xf32>
    %15 = arith.addf %13, %14 : vector<256x256xf32>
    %cst_13 = arith.constant 0.000000e+00 : f32
    %16 = vector.broadcast %cst_13 : f32 to vector<256x256xf32>
    %17 = arith.maximumf %15, %16 : vector<256x256xf32>
    %18 = arith.truncf %17 : vector<256x256xf32> to vector<256x256xbf16>
    %cst_14 = arith.constant dense<0.000000e+00> : vector<256x128xf32>
    %19 = tpu.matmul %18, %10, %cst_14 {dimension_numbers = #tpu.dot_dimension_numbers<[1], [0], [0], [1], [0, 0, 1, 1], [], []>} : vector<256x256xbf16>, vector<256x128xbf16>, vector<256x128xf32> -> vector<256x128xf32>
    %c0_15 = arith.constant 0 : index
    %c0_16 = arith.constant 0 : index
    %20 = vector.load %arg7[%c0_15, %c0_16] : memref<1x128xf32, #tpu.memory_space<vmem>>, vector<1x128xf32>
    %21 = vector.broadcast %20 : vector<1x128xf32> to vector<256x128xf32>
    %22 = arith.addf %19, %21 : vector<256x128xf32>
    %23 = tpu.iota {dimensions = array<i32: 1>} : vector<1x128xi32>
    %c8_i32 = arith.constant 8 : i32
    %24 = vector.broadcast %c8_i32 : i32 to vector<1x128xi32>
    %25 = arith.cmpi slt, %23, %24 : vector<1x128xi32>
    %cst_17 = arith.constant -1.000000e+30 : f32
    %26 = vector.shape_cast %25 : vector<1x128xi1> to vector<1x128xi1>
    %27 = vector.broadcast %26 : vector<1x128xi1> to vector<256x128xi1>
    %28 = vector.broadcast %cst_17 : f32 to vector<256x128xf32>
    %29 = arith.select %27, %22, %28 : vector<256x128xi1>, vector<256x128xf32>
    %cst_18 = arith.constant dense<0xFF800000> : vector<256xf32>
    %30 = vector.multi_reduction <maximumf>, %29, %cst_18 [1] : vector<256x128xf32> to vector<256xf32>
    %31 = vector.shape_cast %30 : vector<256xf32> to vector<256x1xf32>
    %32 = vector.broadcast %31 : vector<256x1xf32> to vector<256x128xf32>
    %33 = arith.subf %29, %32 : vector<256x128xf32>
    %34 = math.exp %33 : vector<256x128xf32>
    %cst_19 = arith.constant 0.000000e+00 : f32
    %35 = vector.shape_cast %25 : vector<1x128xi1> to vector<1x128xi1>
    %36 = vector.broadcast %35 : vector<1x128xi1> to vector<256x128xi1>
    %37 = vector.broadcast %cst_19 : f32 to vector<256x128xf32>
    %38 = arith.select %36, %34, %37 : vector<256x128xi1>, vector<256x128xf32>
    %cst_20 = arith.constant dense<0.000000e+00> : vector<256xf32>
    %39 = vector.multi_reduction <add>, %38, %cst_20 [1] : vector<256x128xf32> to vector<256xf32>
    %40 = vector.shape_cast %39 : vector<256xf32> to vector<256x1xf32>
    %41 = tpu.reciprocal %40 {approx = true} : vector<256x1xf32> -> vector<256x1xf32>
    %42 = arith.mulf %40, %41 : vector<256x1xf32>
    %cst_21 = arith.constant 2.000000e+00 : f32
    %43 = vector.broadcast %cst_21 : f32 to vector<256x1xf32>
    %44 = arith.subf %43, %42 : vector<256x1xf32>
    %45 = arith.mulf %41, %44 : vector<256x1xf32>
    %46 = vector.broadcast %45 : vector<256x1xf32> to vector<256x128xf32>
    %47 = arith.mulf %38, %46 : vector<256x128xf32>
    %48 = arith.truncf %47 : vector<256x128xf32> to vector<256x128xbf16>
    %c0_22 = arith.constant 0 : index
    %c0_23 = arith.constant 0 : index
    %49 = vector.load %arg8[%c0_22, %c0_23] : memref<256x128xbf16, #tpu.memory_space<vmem>>, vector<256x128xbf16>
    tpu.vector_store %arg8[%c0_22, %c0_23], %48 {strides = array<i32>} : memref<256x128xbf16, #tpu.memory_space<vmem>>, vector<256x128xbf16>,
    %50 = vector.extract_strided_slice %22 {offsets = [0, 8], sizes = [256, 1], strides = [1, 1]} : vector<256x128xf32> to vector<256x1xf32>
    %c0_24 = arith.constant 0 : index
    %c0_25 = arith.constant 0 : index
    %51 = vector.load %arg9[%c0_24, %c0_25] : memref<256x1xf32, #tpu.memory_space<vmem>>, vector<256x1xf32>
    tpu.vector_store %arg9[%c0_24, %c0_25], %50 {strides = array<i32>} : memref<256x1xf32, #tpu.memory_space<vmem>>, vector<256x1xf32>,
    return
  }
  func.func @transform_0(%arg0: i32) -> (i32, i32) {
    %c0_i32 = arith.constant 0 : i32
    %c0_i32_0 = arith.constant 0 : i32
    return %arg0, %c0_i32 : i32, i32
  }
  func.func @transform_1(%arg0: i32) -> (i32, i32) {
    %c0_i32 = arith.constant 0 : i32
    %c0_i32_0 = arith.constant 0 : i32
    %c0_i32_1 = arith.constant 0 : i32
    return %c0_i32, %c0_i32_0 : i32, i32
  }
  func.func @transform_2(%arg0: i32) -> (i32, i32) {
    %c0_i32 = arith.constant 0 : i32
    %c0_i32_0 = arith.constant 0 : i32
    %c0_i32_1 = arith.constant 0 : i32
    return %c0_i32, %c0_i32_0 : i32, i32
  }
  func.func @transform_3(%arg0: i32) -> (i32, i32) {
    %c0_i32 = arith.constant 0 : i32
    %c0_i32_0 = arith.constant 0 : i32
    %c0_i32_1 = arith.constant 0 : i32
    return %c0_i32, %c0_i32_0 : i32, i32
  }
  func.func @transform_4(%arg0: i32) -> (i32, i32) {
    %c0_i32 = arith.constant 0 : i32
    %c0_i32_0 = arith.constant 0 : i32
    %c0_i32_1 = arith.constant 0 : i32
    return %c0_i32, %c0_i32_0 : i32, i32
  }
  func.func @transform_5(%arg0: i32) -> (i32, i32) {
    %c0_i32 = arith.constant 0 : i32
    %c0_i32_0 = arith.constant 0 : i32
    %c0_i32_1 = arith.constant 0 : i32
    return %c0_i32, %c0_i32_0 : i32, i32
  }
  func.func @transform_6(%arg0: i32) -> (i32, i32) {
    %c0_i32 = arith.constant 0 : i32
    %c0_i32_0 = arith.constant 0 : i32
    %c0_i32_1 = arith.constant 0 : i32
    return %c0_i32, %c0_i32_0 : i32, i32
  }
  func.func @transform_7(%arg0: i32) -> (i32, i32) {
    %c0_i32 = arith.constant 0 : i32
    %c0_i32_0 = arith.constant 0 : i32
    return %arg0, %c0_i32 : i32, i32
  }
  func.func @transform_8(%arg0: i32) -> (i32, i32) {
    %c0_i32 = arith.constant 0 : i32
    %c0_i32_0 = arith.constant 0 : i32
    return %arg0, %c0_i32 : i32, i32
  }
}

</mosaic_0001>

<bundles_post_ra>
// kernel: tpu_custom_call.1
= control target key start
LH: loop header
LB: loop body
LE: loop exit
PB: predicated region body
PF: predicated region fallthrough
CT: control target
= control target key end

     0   :  { %14 = vsyncpa [#allocation3], 0  ;;  %s3945_s0 = inlined_call_operand.vmem [shape: f32[256,32], index: 0, kind: input, shape index: {}]   ;;  %s3946_s1 = inlined_call_operand.vmem [shape: bf16[32,256], index: 1, kind: input, shape index: {}]   ;;  %s3947_s2 = inlined_call_operand.vmem [shape: f32[1,256], index: 2, kind: input, shape index: {}]   ;;  %s3948_s3 = inlined_call_operand.vmem [shape: bf16[256,256], index: 3, kind: input, shape index: {}]   ;;  %s3949_s4 = inlined_call_operand.vmem [shape: f32[1,256], index: 4, kind: input, shape index: {}]   ;;  %s3950_s5 = inlined_call_operand.hbm [shape: bf16[256,128], index: 5, kind: input, shape index: {}]   ;;  %s3951_s6 = inlined_call_operand.vmem [shape: f32[1,128], index: 6, kind: input, shape index: {}]   ;;  %s3952_s7 = inlined_call_operand.hbm [shape: bf16[256,128], index: 7, kind: output, shape index: {0}]   ;;  %s3953_s8 = inlined_call_operand.vmem [shape: f32[256,1], index: 8, kind: output, shape index: {1}]  }
   0x1   :  { %15 = vsyncpa [#allocation4], 0  ;;  %s2646_s27 = smov [#allocation2]   ;;  %s2598_s9 = scalar_lea.hbm %s3950_s5, 2048 }
   0x2   :  { %s31_s28 = sshll.u32 %s2646_s27, 4  ;;  %p2599_p0 = scmp.ne.s32.totalorder %s3950_s5, %s2598_s9  ;;  %s32_s28 = int_to_ptr.vmem [resolvable:$true] %s31_s28 }
   0x3   :  { %p2602_p1 = scmp.lt.u32.totalorder %s2598_s9, %s3950_s5 }
   0x5   :  { %p2604_p2 = pnand %p2602_p1, %p2599_p0 }
   0x7   :  { %2607 = shalt.err (!%p2604_p2)
}
   0x8   :  { %s2608_s14 = scalar_lea.vmem %s32_s28, 2048  ;;  %p2613_p4 = scmp.lt.s32.totalorder %s32_s28, %s32_s28 }
   0x9   :  { %p2609_p3 = scmp.ne.s32.totalorder %s32_s28, %s2608_s14  ;;  %p2614_p5 = scmp.lt.s32.totalorder %s2608_s14, %s2608_s14 }
   0xb   :  { %p2615_p6 = por %p2614_p5, %p2613_p4 }
   0xd   :  { %p2616_p7 = pnand %p2615_p6, %p2609_p3 }
   0xf   :  { %2619 = shalt.err (!%p2616_p7)
}
  0x10   :  { %s2647_s15 = smov 64   ;;  %s2648_s16 = smov 4  }
  0x11   :  { %37 = dma.hbm_to_vmem [thread:$0]  %s3950_s5, 2048, %s32_s28, [#allocation3], %s2647_s15, %s2647_s15, %s2648_s16  }
  0x12   :  { %2642 = dma.done.wait [#allocation3], 2048  }
  0x13   :  { %2643 = vsyncadd [#allocation3], 4294965248  ;;  %v2649_v0 = vmov 0   ;;  %v2400_v1 = vld [vmem:[%s3946_s1 + $0x4] ss:$8 sps:$4 sm:$0xff]   ;;  %vm128_vm0 = vcmask 261120  }
  0x14   :  { %209 = vmatprep.mubr.bf16.mxu0 %v2649_v0  ;;  %289 = vmatprep.mubr.bf16.mxu1 %v2649_v0  ;;  %v2402_v2 = vld [vmem:[%s3946_s1] ss:$8 sps:$4 sm:$0xff]   ;;  %v2403_v3 = vld [vmem:[%s3946_s1 + $0x14] ss:$8 sps:$4 sm:$0xff]   ;;  %v2405_v4 = vld [vmem:[%s3946_s1 + $0x10] ss:$8 sps:$4 sm:$0xff]  }
  0x15   :  { %177 = vmatprep.subr.bf16.mxu0 %v2400_v1  ;;  %2390 = vmatprep.subr.bf16.mxu1 %v2400_v1  ;;  %v44_v5 = vld [vmem:[%s3945_s0] sm:$0xff]  ;;  %v45_v6 = vld [vmem:[%s3945_s0 + $0x8] sm:$0xff]  ;;  %v46_v10 = vld [vmem:[%s3945_s0 + $0x10] sm:$0xff]  ;;  %s2650_s5 = smov 120   ;;  %vm1996_vm2 = vcmask 7168   ;;  %s2651_s12 = smov [#allocation5]  }
  0x16   :  { %178 = vmatpush1.bf16.msra.mxu0 %v2402_v2  ;;  %2392 = vmatpush1.bf16.msra.mxu1 %v2402_v2  ;;  %v76_v7 = vpack.c.bf16 %v45_v6, %v44_v5  ;;  %v60_v8 = vld [vmem:[%s3945_s0 + $0x80] sm:$0xff]  ;;  %v61_v9 = vld [vmem:[%s3945_s0 + $0x88] sm:$0xff]  ;;  %v47_v14 = vld [vmem:[%s3945_s0 + $0x18] sm:$0xff]  ;;  %s2034_s13 = sshll.u32 %s2651_s12, 4  ;;  %s2035_s13 = int_to_ptr.vmem [resolvable:$true] %s2034_s13 }
  0x17   :  { %179 = vmatprep.subr.bf16.mxu0 %v2403_v3  ;;  %2391 = vmatprep.subr.bf16.mxu1 %v2403_v3  ;;  %v84_v11 = vpack.c.bf16 %v61_v9, %v60_v8  ;;  %v2406_v12 = vld [vmem:[%s3948_s3] ss:$8 sps:$4 sm:$0xff]   ;;  %v2408_v13 = vld [vmem:[%s3948_s3 + $0x4] ss:$8 sps:$4 sm:$0xff]   ;;  %v2411_v15 = vld [vmem:[%s3948_s3 + $0x14] ss:$8 sps:$4 sm:$0xff]   ;;  %v77_v19 = vpack.c.bf16 %v47_v14, %v46_v10  ;;  %p2625_p9 = scmp.lt.s32.totalorder %s2035_s13, %s2035_s13 }
  0x18   :  { %v62_v16 = vld [vmem:[%s3945_s0 + $0x90] sm:$0xff]  ;;  %v63_v17 = vld [vmem:[%s3945_s0 + $0x98] sm:$0xff]  ;;  %v2414_v20 = vld [vmem:[%s3948_s3 + $0x24] ss:$8 sps:$4 sm:$0xff]   ;;  %s2620_s14 = scalar_lea.vmem %s2035_s13, 2048 }
  0x19   :  { %v2409_v18 = vld [vmem:[%s3948_s3 + $0x10] ss:$8 sps:$4 sm:$0xff]   ;;  %v85_v21 = vpack.c.bf16 %v63_v17, %v62_v16  ;;  %v2412_v22 = vld [vmem:[%s3948_s3 + $0x20] ss:$8 sps:$4 sm:$0xff]   ;;  %v2417_v24 = vld [vmem:[%s3948_s3 + $0x34] ss:$8 sps:$4 sm:$0xff]   ;;  %p2621_p8 = scmp.ne.s32.totalorder %s2035_s13, %s2620_s14  ;;  %p2626_p10 = scmp.lt.s32.totalorder %s2620_s14, %s2620_s14 }
  0x1a   :  { %180 = vmatpush1.bf16.msra.mxu0 %v2405_v4  ;;  %2393 = vmatpush1.bf16.msra.mxu1 %v2405_v4  ;;  %v48_v23 = vld [vmem:[%s3945_s0 + $0x20] sm:$0xff]  ;;  %v49_v25 = vld [vmem:[%s3945_s0 + $0x28] sm:$0xff]  ;;  %v2415_v28 = vld [vmem:[%s3948_s3 + $0x30] ss:$8 sps:$4 sm:$0xff]  }
  0x1b   :  { %702 = vmatprep.subr.bf16.mxu1 %v2408_v13  ;;  %v64_v26 = vld [vmem:[%s3945_s0 + $0xa0] sm:$0xff]  ;;  %v65_v27 = vld [vmem:[%s3945_s0 + $0xa8] sm:$0xff]  ;;  %v78_v29 = vpack.c.bf16 %v49_v25, %v48_v23  ;;  %v50_v32 = vld [vmem:[%s3945_s0 + $0x30] sm:$0xff]  ;;  %p2627_p11 = por %p2626_p10, %p2625_p9 }
  0x1c   :  { %v2420_v30 = vld [vmem:[%s3948_s3 + $0x44] ss:$8 sps:$4 sm:$0xff]   ;;  %v86_v31 = vpack.c.bf16 %v65_v27, %v64_v26  ;;  %v2418_v33 = vld [vmem:[%s3948_s3 + $0x40] ss:$8 sps:$4 sm:$0xff]   ;;  %v2423_v34 = vld [vmem:[%s3948_s3 + $0x54] ss:$8 sps:$4 sm:$0xff]  }
  0x1d   :  { %2054 = vmatmul.mubr.msk.bf16.vlgmr.msra.gmra.mrb[0].mxu0 %vm128_vm0, %v76_v7  ;;  %2062 = vmatmul.mubr.msk.bf16.vlgmr.msra.gmra.mrb[0].mxu1 %vm128_vm0, %v84_v11  ;;  %v51_v35 = vld [vmem:[%s3945_s0 + $0x38] sm:$0xff]  ;;  %v66_v36 = vld [vmem:[%s3945_s0 + $0xb0] sm:$0xff]  ;;  %v2426_v40 = vld [vmem:[%s3948_s3 + $0x64] ss:$8 sps:$4 sm:$0xff]   ;;  %p2628_p12 = pnand %p2627_p11, %p2621_p8 }
  0x1e   :  { %219 = vmatprep.mubr.bf16.mxu0 %v2649_v0  ;;  %299 = vmatprep.mubr.bf16.mxu1 %v2649_v0  ;;  %v67_v37 = vld [vmem:[%s3945_s0 + $0xb8] sm:$0xff]  ;;  %v79_v39 = vpack.c.bf16 %v51_v35, %v50_v32  ;;  %v2424_v42 = vld [vmem:[%s3948_s3 + $0x60] ss:$8 sps:$4 sm:$0xff]   ;;  %v2432_v49 = vld [vmem:[%s3948_s3 + $0x84] ss:$8 sps:$4 sm:$0xff]  }
  0x1f   :  { %703 = vmatpush1.bf16.msra.mxu1 %v2406_v12  ;;  %v2421_v38 = vld [vmem:[%s3948_s3 + $0x50] ss:$8 sps:$4 sm:$0xff]   ;;  %v87_v41 = vpack.c.bf16 %v67_v37, %v66_v36  ;;  %v2429_v43 = vld [vmem:[%s3948_s3 + $0x74] ss:$8 sps:$4 sm:$0xff]   ;;  %v52_v44 = vld [vmem:[%s3945_s0 + $0x40] sm:$0xff] }
  0x20   :  { %704 = vmatprep.subr.bf16.mxu1 %v2411_v15  ;;  %v53_v45 = vld [vmem:[%s3945_s0 + $0x48] sm:$0xff]  ;;  %v68_v46 = vld [vmem:[%s3945_s0 + $0xc0] sm:$0xff]  ;;  %v2427_v48 = vld [vmem:[%s3948_s3 + $0x70] ss:$8 sps:$4 sm:$0xff]  }
  0x21   :  { %v69_v47 = vld [vmem:[%s3945_s0 + $0xc8] sm:$0xff]  ;;  %v80_v50 = vpack.c.bf16 %v53_v45, %v52_v44  ;;  %v2435_v53 = vld [vmem:[%s3948_s3 + $0x94] ss:$8 sps:$4 sm:$0xff]   ;;  %v2433_v58 = vld [vmem:[%s3948_s3 + $0x90] ss:$8 sps:$4 sm:$0xff]  }
  0x22   :  { %v88_v51 = vpack.c.bf16 %v69_v47, %v68_v46  ;;  %v2430_v52 = vld [vmem:[%s3948_s3 + $0x80] ss:$8 sps:$4 sm:$0xff]   ;;  %v54_v54 = vld [vmem:[%s3945_s0 + $0x50] sm:$0xff]  ;;  %v55_v55 = vld [vmem:[%s3945_s0 + $0x58] sm:$0xff] }
  0x23   :  { %705 = vmatpush1.bf16.msra.mxu1 %v2409_v18  ;;  %v70_v56 = vld [vmem:[%s3945_s0 + $0xd0] sm:$0xff]  ;;  %v71_v57 = vld [vmem:[%s3945_s0 + $0xd8] sm:$0xff]  ;;  %v81_v59 = vpack.c.bf16 %v55_v55, %v54_v54  ;;  %v2438_v60 = vld [vmem:[%s3948_s3 + $0xa4] ss:$8 sps:$4 sm:$0xff]  }
  0x24   :  { %706 = vmatprep.subr.bf16.mxu1 %v2414_v20  ;;  %v89_v61 = vpack.c.bf16 %v71_v57, %v70_v56  ;;  %v2436_v62 = vld [vmem:[%s3948_s3 + $0xa0] ss:$8 sps:$4 sm:$0xff]   ;;  %v2441_v63 = vld [vmem:[%s3948_s3 + $0xb4] ss:$8 sps:$4 sm:$0xff]   ;;  %v2439_v5 = vld [vmem:[%s3948_s3 + $0xb0] ss:$8 sps:$4 sm:$0xff]  }
  0x25   :  { %2055 = vmatmul.mubr.msk.bf16.gmra.mrb[4].mxu0 %vm128_vm0, %v77_v19  ;;  %2063 = vmatmul.mubr.msk.bf16.gmra.mrb[4].mxu1 %vm128_vm0, %v85_v21  ;;  %v56_v1 = vld [vmem:[%s3945_s0 + $0x60] sm:$0xff]  ;;  %v57_v2 = vld [vmem:[%s3945_s0 + $0x68] sm:$0xff]  ;;  %v2447_v10 = vld [vmem:[%s3948_s3 + $0xd4] ss:$8 sps:$4 sm:$0xff]  }
  0x26   :  { %229 = vmatprep.mubr.bf16.mxu0 %v2649_v0  ;;  %309 = vmatprep.mubr.bf16.mxu1 %v2649_v0  ;;  %v72_v3 = vld [vmem:[%s3945_s0 + $0xe0] sm:$0xff]  ;;  %v73_v4 = vld [vmem:[%s3945_s0 + $0xe8] sm:$0xff]  ;;  %v82_v6 = vpack.c.bf16 %v57_v2, %v56_v1  ;;  %v58_v11 = vld [vmem:[%s3945_s0 + $0x70] sm:$0xff] }
  0x27   :  { %707 = vmatpush1.bf16.msra.mxu1 %v2412_v22  ;;  %v2444_v7 = vld [vmem:[%s3948_s3 + $0xc4] ss:$8 sps:$4 sm:$0xff]   ;;  %v90_v8 = vpack.c.bf16 %v73_v4, %v72_v3  ;;  %v2442_v9 = vld [vmem:[%s3948_s3 + $0xc0] ss:$8 sps:$4 sm:$0xff]   ;;  %v59_v12 = vld [vmem:[%s3945_s0 + $0x78] sm:$0xff] }
  0x28   :  { %708 = vmatprep.subr.bf16.mxu1 %v2417_v24  ;;  %v74_v13 = vld [vmem:[%s3945_s0 + $0xf0] sm:$0xff]  ;;  %v75_v14 = vld [vmem:[%s3945_s0 + $0xf8] sm:$0xff]  ;;  %v83_v16 = vpack.c.bf16 %v59_v12, %v58_v11  ;;  %v2448_v18 = vld [vmem:[%s3948_s3 + $0xe0] ss:$8 sps:$4 sm:$0xff]  }
  0x29   :  { %v2445_v15 = vld [vmem:[%s3948_s3 + $0xd0] ss:$8 sps:$4 sm:$0xff]   ;;  %v91_v17 = vpack.c.bf16 %v75_v14, %v74_v13  ;;  %v2453_v19 = vld [vmem:[%s3948_s3 + $0xf4] ss:$8 sps:$4 sm:$0xff]   ;;  %v2454_v21 = vld [vmem:[#allocation2 + $0x40] sm:$0xff]  }
  0x2a   :  { %v2451_v20 = vld [vmem:[%s3948_s3 + $0xf0] ss:$8 sps:$4 sm:$0xff]   ;;  %v2455_v22 = vld [vmem:[#allocation2] sm:$0xff]   ;;  %2278 = vmatprep.subr.bf16.mxu0 %v2454_v21  ;;  %v2456_v23 = vld [vmem:[#allocation2 + $0x48] sm:$0xff]  }
  0x2b   :  { %709 = vmatpush1.bf16.msra.mxu1 %v2415_v28  ;;  %2279 = vmatpush3.bf16.msra.mxu0 %v2455_v22  ;;  %v2457_v24 = vld [vmem:[#allocation2 + $0x8] sm:$0xff]   ;;  %v2458_v25 = vld [vmem:[#allocation2 + $0x50] sm:$0xff]   ;;  %v2460_v27 = vld [vmem:[#allocation2 + $0x58] sm:$0xff]  }
  0x2c   :  { %710 = vmatprep.subr.bf16.mxu1 %v2420_v30  ;;  %2280 = vmatprep.subr.bf16.mxu0 %v2456_v23  ;;  %v2459_v26 = vld [vmem:[#allocation2 + $0x10] sm:$0xff]   ;;  %v2461_v28 = vld [vmem:[#allocation2 + $0x18] sm:$0xff]   ;;  %v2462_v30 = vld [vmem:[#allocation2 + $0x60] sm:$0xff]  }
  0x2d   :  { %2056 = vmatmul.mubr.msk.bf16.gmra.mrb[8].mxu0 %vm128_vm0, %v78_v29  ;;  %2064 = vmatmul.mubr.msk.bf16.gmra.mrb[8].mxu1 %vm128_vm0, %v86_v31  ;;  %v98_v29 = vlaneseq  ;;  %v2463_v31 = vld [vmem:[#allocation2 + $0x20] sm:$0xff]   ;;  %v2464_v36 = vld [vmem:[#allocation2 + $0x68] sm:$0xff]  }
  0x2e   :  { %239 = vmatprep.mubr.bf16.mxu0 %v2649_v0  ;;  %319 = vmatprep.mubr.bf16.mxu1 %v2649_v0  ;;  %v2465_v37 = vld [vmem:[#allocation2 + $0x28] sm:$0xff]  }
  0x2f   :  { %711 = vmatpush1.bf16.msra.mxu1 %v2418_v33  ;;  %2281 = vmatpush3.bf16.msra.mxu0 %v2457_v24  ;;  %v2949_v32 = vshrl.u32 %v98_v29, 7 }
  0x30   :  { %712 = vmatprep.subr.bf16.mxu1 %v2423_v34  ;;  %2282 = vmatprep.subr.bf16.mxu0 %v2458_v25  ;;  %v96_v34 = vld [vmem:[%s3947_s2] sm:$0x3] }
  0x31   :  { %v100_v33 = vsub.s32 0, %v2949_v32  ;;  %v104_v35 = vsub.s32 1, %v2949_v32 }
  0x33   :  { %713 = vmatpush1.bf16.msra.mxu1 %v2421_v38  ;;  %2283 = vmatpush3.bf16.msra.mxu0 %v2459_v26  ;;  %v2958_v38 = vrot.slane %v96_v34, %v100_v33 }
  0x34   :  { %714 = vmatprep.subr.bf16.mxu1 %v2426_v40  ;;  %2284 = vmatprep.subr.bf16.mxu0 %v2460_v27 }
  0x35   :  { %2057 = vmatmul.mubr.msk.bf16.gmra.mrb[12].mxu0 %vm128_vm0, %v79_v39  ;;  %2065 = vmatmul.mubr.msk.bf16.gmra.mrb[12].mxu1 %vm128_vm0, %v87_v41  ;;  %v2962_v39 = vrot.slane %v96_v34, %v104_v35 }
  0x36   :  { %249 = vmatprep.mubr.bf16.mxu0 %v2649_v0  ;;  %329 = vmatprep.mubr.bf16.mxu1 %v2649_v0 }
  0x37   :  { %715 = vmatpush1.bf16.msra.mxu1 %v2424_v42  ;;  %2285 = vmatpush3.bf16.msra.mxu0 %v2461_v28 }
  0x38   :  { %716 = vmatprep.subr.bf16.mxu1 %v2429_v43  ;;  %2286 = vmatprep.subr.bf16.mxu0 %v2462_v30 }
  0x3b   :  { %717 = vmatpush1.bf16.msra.mxu1 %v2427_v48  ;;  %2287 = vmatpush3.bf16.msra.mxu0 %v2463_v31 }
  0x3c   :  { %718 = vmatprep.subr.bf16.mxu1 %v2432_v49  ;;  %2288 = vmatprep.subr.bf16.mxu0 %v2464_v36 }
  0x3d   :  { %2058 = vmatmul.mubr.msk.bf16.gmra.mrb[16].mxu0 %vm128_vm0, %v80_v50  ;;  %2066 = vmatmul.mubr.msk.bf16.gmra.mrb[16].mxu1 %vm128_vm0, %v88_v51 }
  0x3e   :  { %259 = vmatprep.mubr.bf16.mxu0 %v2649_v0  ;;  %339 = vmatprep.mubr.bf16.mxu1 %v2649_v0 }
  0x3f   :  { %719 = vmatpush1.bf16.msra.mxu1 %v2430_v52  ;;  %2289 = vmatpush3.bf16.msra.mxu0 %v2465_v37  ;;  %v2466_v52 = vld [vmem:[#allocation2 + $0x70] sm:$0xff]  }
  0x40   :  { %720 = vmatprep.subr.bf16.mxu1 %v2435_v53  ;;  %v2467_v53 = vld [vmem:[#allocation2 + $0x30] sm:$0xff]   ;;  %2290 = vmatprep.subr.bf16.mxu0 %v2466_v52 }
  0x43   :  { %721 = vmatpush1.bf16.msra.mxu1 %v2433_v58  ;;  %2291 = vmatpush3.bf16.msra.mxu0 %v2467_v53 }
  0x44   :  { %722 = vmatprep.subr.bf16.mxu1 %v2438_v60 }
  0x45   :  { %2059 = vmatmul.mubr.msk.bf16.gmra.mrb[20].mxu0 %vm128_vm0, %v81_v59  ;;  %2067 = vmatmul.mubr.msk.bf16.gmra.mrb[20].mxu1 %vm128_vm0, %v89_v61 }
  0x46   :  { %269 = vmatprep.mubr.bf16.mxu0 %v2649_v0  ;;  %349 = vmatprep.mubr.bf16.mxu1 %v2649_v0 }
  0x47   :  { %723 = vmatpush1.bf16.msra.mxu1 %v2436_v62 }
  0x48   :  { %724 = vmatprep.subr.bf16.mxu1 %v2441_v63 }
  0x4b   :  { %725 = vmatpush1.bf16.msra.mxu1 %v2439_v5 }
  0x4c   :  { %726 = vmatprep.subr.bf16.mxu1 %v2444_v7 }
  0x4d   :  { %2060 = vmatmul.mubr.msk.bf16.gmra.mrb[24].mxu0 %vm128_vm0, %v82_v6  ;;  %2068 = vmatmul.mubr.msk.bf16.gmra.mrb[24].mxu1 %vm128_vm0, %v90_v8 }
  0x4e   :  { %279 = vmatprep.mubr.bf16.mxu0 %v2649_v0  ;;  %359 = vmatprep.mubr.bf16.mxu1 %v2649_v0  ;;  %v2450_v0 = vld [vmem:[%s3948_s3 + $0xe4] ss:$8 sps:$4 sm:$0xff]  }
  0x4f   :  { %727 = vmatpush1.bf16.msra.mxu1 %v2442_v9 }
  0x50   :  { %728 = vmatprep.subr.bf16.mxu1 %v2447_v10 }
  0x53   :  { %729 = vmatpush1.bf16.msra.mxu1 %v2445_v15 }
  0x54   :  { %730 = vmatprep.subr.bf16.mxu1 %v2450_v0 }
  0x55   :  { %2061 = vmatmul.mubr.msk.bf16.gmra.mrb[28].mxu0 %vm128_vm0, %v83_v16  ;;  %2069 = vmatmul.mubr.msk.bf16.gmra.mrb[28].mxu1 %vm128_vm0, %v91_v17 }
  0x57   :  { %731 = vmatpush1.bf16.msra.mxu1 %v2448_v18 }
  0x58   :  { %732 = vmatprep.subr.bf16.mxu1 %v2453_v19 }
  0x5b   :  { %733 = vmatpush1.bf16.msra.mxu1 %v2451_v20 }
  0xf0   :  { %v211_v40 = vpop.f32.mrb[0].mxu0  ;;  %v291_v43 = vpop.f32.mrb[0].mxu1 }
  0xf1   :  { %v212_v41 = vadd.f32 %v211_v40, %v2958_v38  ;;  %v213_v42 = vpop.f32.mrb[1].mxu0  ;;  %v292_v46 = vadd.f32 %v291_v43, %v2958_v38  ;;  %v293_v47 = vpop.f32.mrb[1].mxu1 }
  0xf2   :  { %v214_v44 = vadd.f32 %v213_v42, %v2962_v39  ;;  %v215_v45 = vpop.f32.mrb[2].mxu0  ;;  %v294_v50 = vadd.f32 %v293_v47, %v2962_v39  ;;  %v295_v51 = vpop.f32.mrb[2].mxu1 }
  0xf3   :  { %v216_v48 = vadd.f32 %v215_v45, %v2958_v38  ;;  %v217_v49 = vpop.f32.mrb[3].mxu0  ;;  %v402_v55 = vmax.f32 %v292_v46, 0.0  ;;  %v296_v56 = vadd.f32 %v295_v51, %v2958_v38  ;;  %v297_v57 = vpop.f32.mrb[3].mxu1  ;;  %v370_v58 = vmax.f32 %v212_v41, 0.0 }
  0xf4   :  { %v218_v54 = vadd.f32 %v217_v49, %v2962_v39  ;;  %v403_v60 = vmax.f32 %v294_v50, 0.0  ;;  %v298_v61 = vadd.f32 %v297_v57, %v2962_v39  ;;  %v371_v62 = vmax.f32 %v214_v44, 0.0 }
  0xf5   :  { %v372_v59 = vmax.f32 %v216_v48, 0.0  ;;  %v404_v1 = vmax.f32 %v296_v56, 0.0 }
  0xf6   :  { %v373_v63 = vmax.f32 %v218_v54, 0.0  ;;  %v405_v3 = vmax.f32 %v298_v61, 0.0 }
  0xf7   :  { %v434_v2 = vpack.c.bf16 %v372_v59, %v370_v58  ;;  %v2972_v6 = vpack.c.bf16 %v404_v1, %v402_v55 }
  0xf8   :  { %v435_v4 = vpack.c.bf16 %v373_v63, %v371_v62  ;;  %v221_v5 = vpop.f32.mrb[4].mxu0  ;;  %v2975_v9 = vpack.c.bf16 %v405_v3, %v403_v60  ;;  %v301_v10 = vpop.f32.mrb[4].mxu1 }
  0xf9   :  { %v222_v7 = vadd.f32 %v221_v5, %v2958_v38  ;;  %v223_v8 = vpop.f32.mrb[5].mxu0  ;;  %v302_v13 = vadd.f32 %v301_v10, %v2958_v38  ;;  %v303_v14 = vpop.f32.mrb[5].mxu1 }
  0xfa   :  { %v224_v11 = vadd.f32 %v223_v8, %v2962_v39  ;;  %v225_v12 = vpop.f32.mrb[6].mxu0  ;;  %734 = vmatprep.mubr.bf16.mxu1 %v435_v4  ;;  %v304_v17 = vadd.f32 %v303_v14, %v2962_v39  ;;  %v305_v0 = vpop.f32.mrb[6].mxu1 }
  0xfb   :  { %v226_v15 = vadd.f32 %v225_v12, %v2958_v38  ;;  %v227_v16 = vpop.f32.mrb[7].mxu0  ;;  %735 = vmatmul.mubr.bf16.vlgmr.msra.gmra.mrb[32].mxu1 %v434_v2  ;;  %v406_v19 = vmax.f32 %v302_v13, 0.0  ;;  %v306_v20 = vadd.f32 %v305_v0, %v2958_v38  ;;  %v307_v21 = vpop.f32.mrb[7].mxu1  ;;  %v374_v22 = vmax.f32 %v222_v7, 0.0 }
  0xfc   :  { %v228_v18 = vadd.f32 %v227_v16, %v2962_v39  ;;  %v407_v24 = vmax.f32 %v304_v17, 0.0  ;;  %v308_v25 = vadd.f32 %v307_v21, %v2962_v39  ;;  %v375_v26 = vmax.f32 %v224_v11, 0.0 }
  0xfd   :  { %v376_v23 = vmax.f32 %v226_v15, 0.0  ;;  %v408_v28 = vmax.f32 %v306_v20, 0.0 }
  0xfe   :  { %v377_v27 = vmax.f32 %v228_v18, 0.0  ;;  %v409_v31 = vmax.f32 %v308_v25, 0.0 }
  0xff   :  { %v436_v30 = vpack.c.bf16 %v376_v23, %v374_v22  ;;  %v2984_v37 = vpack.c.bf16 %v408_v28, %v406_v19 }
 0x100   :  { %v437_v34 = vpack.c.bf16 %v377_v27, %v375_v26  ;;  %v231_v36 = vpop.f32.mrb[8].mxu0  ;;  %v2987_v42 = vpack.c.bf16 %v409_v31, %v407_v24  ;;  %v311_v43 = vpop.f32.mrb[8].mxu1 }
 0x101   :  { %v232_v40 = vadd.f32 %v231_v36, %v2958_v38  ;;  %v233_v41 = vpop.f32.mrb[9].mxu0  ;;  %v312_v46 = vadd.f32 %v311_v43, %v2958_v38  ;;  %v313_v47 = vpop.f32.mrb[9].mxu1 }
 0x102   :  { %744 = vmatprep.mubr.bf16.mxu1 %v437_v34  ;;  %v234_v44 = vadd.f32 %v233_v41, %v2962_v39  ;;  %v235_v45 = vpop.f32.mrb[10].mxu0  ;;  %v314_v51 = vadd.f32 %v313_v47, %v2962_v39  ;;  %v315_v52 = vpop.f32.mrb[10].mxu1 }
 0x103   :  { %745 = vmatmul.mubr.bf16.gmra.mrb[36].mxu1 %v436_v30  ;;  %v378_v48 = vmax.f32 %v232_v40, 0.0  ;;  %v236_v49 = vadd.f32 %v235_v45, %v2958_v38  ;;  %v237_v50 = vpop.f32.mrb[11].mxu0  ;;  %v410_v55 = vmax.f32 %v312_v46, 0.0  ;;  %v316_v56 = vadd.f32 %v315_v52, %v2958_v38  ;;  %v317_v57 = vpop.f32.mrb[11].mxu1 }
 0x104   :  { %v379_v53 = vmax.f32 %v234_v44, 0.0  ;;  %v238_v54 = vadd.f32 %v237_v50, %v2962_v39  ;;  %v411_v59 = vmax.f32 %v314_v51, 0.0  ;;  %v318_v60 = vadd.f32 %v317_v57, %v2962_v39 }
 0x105   :  { %v380_v58 = vmax.f32 %v236_v49, 0.0  ;;  %v412_v62 = vmax.f32 %v316_v56, 0.0 }
 0x106   :  { %v381_v61 = vmax.f32 %v238_v54, 0.0  ;;  %v413_v1 = vmax.f32 %v318_v60, 0.0 }
 0x107   :  { %v438_v63 = vpack.c.bf16 %v380_v58, %v378_v48  ;;  %v2996_v4 = vpack.c.bf16 %v412_v62, %v410_v55 }
 0x108   :  { %v439_v2 = vpack.c.bf16 %v381_v61, %v379_v53  ;;  %v241_v3 = vpop.f32.mrb[12].mxu0  ;;  %v2999_v8 = vpack.c.bf16 %v413_v1, %v411_v59  ;;  %v321_v10 = vpop.f32.mrb[12].mxu1 }
 0x109   :  { %v242_v5 = vadd.f32 %v241_v3, %v2958_v38  ;;  %v243_v7 = vpop.f32.mrb[13].mxu0  ;;  %v322_v13 = vadd.f32 %v321_v10, %v2958_v38  ;;  %v323_v14 = vpop.f32.mrb[13].mxu1 }
 0x10a   :  { %754 = vmatprep.mubr.bf16.mxu1 %v439_v2  ;;  %v244_v11 = vadd.f32 %v243_v7, %v2962_v39  ;;  %v245_v12 = vpop.f32.mrb[14].mxu0  ;;  %v324_v0 = vadd.f32 %v323_v14, %v2962_v39  ;;  %v325_v18 = vpop.f32.mrb[14].mxu1 }
 0x10b   :  { %755 = vmatmul.mubr.bf16.gmra.mrb[40].mxu1 %v438_v63  ;;  %v382_v15 = vmax.f32 %v242_v5, 0.0  ;;  %v246_v16 = vadd.f32 %v245_v12, %v2958_v38  ;;  %v247_v17 = vpop.f32.mrb[15].mxu0  ;;  %v414_v21 = vmax.f32 %v322_v13, 0.0  ;;  %v326_v22 = vadd.f32 %v325_v18, %v2958_v38  ;;  %v327_v23 = vpop.f32.mrb[15].mxu1 }
 0x10c   :  { %v383_v19 = vmax.f32 %v244_v11, 0.0  ;;  %v248_v20 = vadd.f32 %v247_v17, %v2962_v39  ;;  %v415_v25 = vmax.f32 %v324_v0, 0.0  ;;  %v328_v26 = vadd.f32 %v327_v23, %v2962_v39 }
 0x10d   :  { %v384_v24 = vmax.f32 %v246_v16, 0.0  ;;  %v416_v28 = vmax.f32 %v326_v22, 0.0 }
 0x10e   :  { %v385_v27 = vmax.f32 %v248_v20, 0.0  ;;  %v417_v31 = vmax.f32 %v328_v26, 0.0 }
 0x10f   :  { %v440_v30 = vpack.c.bf16 %v384_v24, %v382_v15  ;;  %v3008_v40 = vpack.c.bf16 %v416_v28, %v414_v21 }
 0x110   :  { %v441_v34 = vpack.c.bf16 %v385_v27, %v383_v19  ;;  %v251_v36 = vpop.f32.mrb[16].mxu0  ;;  %v3011_v44 = vpack.c.bf16 %v417_v31, %v415_v25  ;;  %v331_v45 = vpop.f32.mrb[16].mxu1 }
 0x111   :  { %v252_v41 = vadd.f32 %v251_v36, %v2958_v38  ;;  %v253_v43 = vpop.f32.mrb[17].mxu0  ;;  %v332_v48 = vadd.f32 %v331_v45, %v2958_v38  ;;  %v333_v49 = vpop.f32.mrb[17].mxu1 }
 0x112   :  { %v254_v46 = vadd.f32 %v253_v43, %v2962_v39  ;;  %v255_v47 = vpop.f32.mrb[18].mxu0  ;;  %764 = vmatprep.mubr.bf16.mxu1 %v441_v34  ;;  %v334_v53 = vadd.f32 %v333_v49, %v2962_v39  ;;  %v335_v54 = vpop.f32.mrb[18].mxu1 }
 0x113   :  { %v386_v50 = vmax.f32 %v252_v41, 0.0  ;;  %v256_v51 = vadd.f32 %v255_v47, %v2958_v38  ;;  %v257_v52 = vpop.f32.mrb[19].mxu0  ;;  %765 = vmatmul.mubr.bf16.gmra.mrb[44].mxu1 %v440_v30  ;;  %v418_v57 = vmax.f32 %v332_v48, 0.0  ;;  %v336_v58 = vadd.f32 %v335_v54, %v2958_v38  ;;  %v337_v59 = vpop.f32.mrb[19].mxu1 }
 0x114   :  { %v387_v55 = vmax.f32 %v254_v46, 0.0  ;;  %v258_v56 = vadd.f32 %v257_v52, %v2962_v39  ;;  %v419_v61 = vmax.f32 %v334_v53, 0.0  ;;  %v338_v62 = vadd.f32 %v337_v59, %v2962_v39 }
 0x115   :  { %v388_v60 = vmax.f32 %v256_v51, 0.0  ;;  %v420_v1 = vmax.f32 %v336_v58, 0.0 }
 0x116   :  { %v389_v63 = vmax.f32 %v258_v56, 0.0  ;;  %v421_v3 = vmax.f32 %v338_v62, 0.0 }
 0x117   :  { %v442_v2 = vpack.c.bf16 %v388_v60, %v386_v50  ;;  %v3020_v10 = vpack.c.bf16 %v420_v1, %v418_v57 }
 0x118   :  { %v443_v5 = vpack.c.bf16 %v389_v63, %v387_v55  ;;  %v261_v7 = vpop.f32.mrb[20].mxu0  ;;  %v3023_v13 = vpack.c.bf16 %v421_v3, %v419_v61  ;;  %v341_v14 = vpop.f32.mrb[20].mxu1 }
 0x119   :  { %v262_v11 = vadd.f32 %v261_v7, %v2958_v38  ;;  %v263_v12 = vpop.f32.mrb[21].mxu0  ;;  %v342_v17 = vadd.f32 %v341_v14, %v2958_v38  ;;  %v343_v0 = vpop.f32.mrb[21].mxu1 }
 0x11a   :  { %v264_v15 = vadd.f32 %v263_v12, %v2962_v39  ;;  %v265_v16 = vpop.f32.mrb[22].mxu0  ;;  %774 = vmatprep.mubr.bf16.mxu1 %v443_v5  ;;  %v344_v21 = vadd.f32 %v343_v0, %v2962_v39  ;;  %v345_v22 = vpop.f32.mrb[22].mxu1 }
 0x11b   :  { %v390_v18 = vmax.f32 %v262_v11, 0.0  ;;  %v266_v19 = vadd.f32 %v265_v16, %v2958_v38  ;;  %v267_v20 = vpop.f32.mrb[23].mxu0  ;;  %775 = vmatmul.mubr.bf16.gmra.mrb[48].mxu1 %v442_v2  ;;  %v422_v25 = vmax.f32 %v342_v17, 0.0  ;;  %v346_v26 = vadd.f32 %v345_v22, %v2958_v38  ;;  %v347_v27 = vpop.f32.mrb[23].mxu1 }
 0x11c   :  { %v391_v23 = vmax.f32 %v264_v15, 0.0  ;;  %v268_v24 = vadd.f32 %v267_v20, %v2962_v39  ;;  %v423_v30 = vmax.f32 %v344_v21, 0.0  ;;  %v348_v31 = vadd.f32 %v347_v27, %v2962_v39 }
 0x11d   :  { %v392_v28 = vmax.f32 %v266_v19, 0.0  ;;  %v424_v36 = vmax.f32 %v346_v26, 0.0 }
 0x11e   :  { %v393_v34 = vmax.f32 %v268_v24, 0.0  ;;  %v425_v43 = vmax.f32 %v348_v31, 0.0 }
 0x11f   :  { %v444_v41 = vpack.c.bf16 %v392_v28, %v390_v18  ;;  %v3032_v47 = vpack.c.bf16 %v424_v36, %v422_v25 }
 0x120   :  { %v445_v45 = vpack.c.bf16 %v393_v34, %v391_v23  ;;  %v271_v46 = vpop.f32.mrb[24].mxu0  ;;  %v3035_v50 = vpack.c.bf16 %v425_v43, %v423_v30  ;;  %v351_v51 = vpop.f32.mrb[24].mxu1 }
 0x121   :  { %v272_v48 = vadd.f32 %v271_v46, %v2958_v38  ;;  %v273_v49 = vpop.f32.mrb[25].mxu0  ;;  %v352_v54 = vadd.f32 %v351_v51, %v2958_v38  ;;  %v353_v55 = vpop.f32.mrb[25].mxu1 }
 0x122   :  { %v274_v52 = vadd.f32 %v273_v49, %v2962_v39  ;;  %v275_v53 = vpop.f32.mrb[26].mxu0  ;;  %784 = vmatprep.mubr.bf16.mxu1 %v445_v45  ;;  %v354_v59 = vadd.f32 %v353_v55, %v2962_v39  ;;  %v355_v60 = vpop.f32.mrb[26].mxu1 }
 0x123   :  { %v394_v56 = vmax.f32 %v272_v48, 0.0  ;;  %v276_v57 = vadd.f32 %v275_v53, %v2958_v38  ;;  %v277_v58 = vpop.f32.mrb[27].mxu0  ;;  %785 = vmatmul.mubr.bf16.gmra.mrb[52].mxu1 %v444_v41  ;;  %v426_v63 = vmax.f32 %v352_v54, 0.0  ;;  %v356_v1 = vadd.f32 %v355_v60, %v2958_v38  ;;  %v357_v2 = vpop.f32.mrb[27].mxu1 }
 0x124   :  { %v395_v61 = vmax.f32 %v274_v52, 0.0  ;;  %v278_v62 = vadd.f32 %v277_v58, %v2962_v39  ;;  %v427_v5 = vmax.f32 %v354_v59, 0.0  ;;  %v358_v7 = vadd.f32 %v357_v2, %v2962_v39 }
 0x125   :  { %v396_v3 = vmax.f32 %v276_v57, 0.0  ;;  %v428_v12 = vmax.f32 %v356_v1, 0.0 }
 0x126   :  { %v397_v11 = vmax.f32 %v278_v62, 0.0  ;;  %v429_v15 = vmax.f32 %v358_v7, 0.0 }
 0x127   :  { %v446_v14 = vpack.c.bf16 %v396_v3, %v394_v56  ;;  %v462_v0 = vpack.c.bf16 %v428_v12, %v426_v63 }
 0x128   :  { %v447_v16 = vpack.c.bf16 %v397_v11, %v395_v61  ;;  %v281_v17 = vpop.f32.mrb[28].mxu0  ;;  %v463_v20 = vpack.c.bf16 %v429_v15, %v427_v5  ;;  %v361_v21 = vpop.f32.mrb[28].mxu1 }
 0x129   :  { %v282_v18 = vadd.f32 %v281_v17, %v2958_v38  ;;  %v283_v19 = vpop.f32.mrb[29].mxu0  ;;  %v362_v24 = vadd.f32 %v361_v21, %v2958_v38  ;;  %v363_v25 = vpop.f32.mrb[29].mxu1 }
 0x12a   :  { %v284_v22 = vadd.f32 %v283_v19, %v2962_v39  ;;  %v285_v23 = vpop.f32.mrb[30].mxu0  ;;  %794 = vmatprep.mubr.bf16.mxu1 %v447_v16  ;;  %v364_v30 = vadd.f32 %v363_v25, %v2962_v39  ;;  %v365_v31 = vpop.f32.mrb[30].mxu1 }
 0x12b   :  { %v398_v26 = vmax.f32 %v282_v18, 0.0  ;;  %v286_v27 = vadd.f32 %v285_v23, %v2958_v38  ;;  %v287_v28 = vpop.f32.mrb[31].mxu0  ;;  %795 = vmatmul.mubr.bf16.gmra.mrb[56].mxu1 %v446_v14  ;;  %v430_v41 = vmax.f32 %v362_v24, 0.0  ;;  %v366_v43 = vadd.f32 %v365_v31, %v2958_v38  ;;  %v367_v45 = vpop.f32.mrb[31].mxu1  ;;  %v2468_v38 = vld [vmem:[#allocation2 + $0x78] sm:$0xff]  }
 0x12c   :  { %v399_v34 = vmax.f32 %v284_v22, 0.0  ;;  %v288_v36 = vadd.f32 %v287_v28, %v2962_v39  ;;  %v431_v48 = vmax.f32 %v364_v30, 0.0  ;;  %v368_v49 = vadd.f32 %v367_v45, %v2962_v39  ;;  %v2469_v39 = vld [vmem:[#allocation2 + $0x38] sm:$0xff]   ;;  %2292 = vmatprep.subr.bf16.mxu0 %v2468_v38 }
 0x12d   :  { %v400_v46 = vmax.f32 %v286_v27, 0.0  ;;  %v432_v52 = vmax.f32 %v366_v43, 0.0  ;;  %2293 = vmatpush3.bf16.msra.mxu0 %v2469_v39 }
 0x12e   :  { %v401_v51 = vmax.f32 %v288_v36, 0.0  ;;  %v433_v54 = vmax.f32 %v368_v49, 0.0 }
 0x12f   :  { %v448_v53 = vpack.c.bf16 %v400_v46, %v398_v26  ;;  %v464_v56 = vpack.c.bf16 %v432_v52, %v430_v41 }
 0x130   :  { %v449_v55 = vpack.c.bf16 %v401_v51, %v399_v34  ;;  %v465_v57 = vpack.c.bf16 %v433_v54, %v431_v48 }
 0x132   :  { %804 = vmatprep.mubr.bf16.mxu1 %v449_v55 }
 0x133   :  { %805 = vmatmul.mubr.bf16.gmra.mrb[60].mxu1 %v448_v53 }
 0x134   :  { %814 = vmatprep.mubr.bf16.mxu1 %v2975_v9 }
 0x13b   :  { %815 = vmatmul.mubr.bf16.gmra.mrb[64].mxu1 %v2972_v6  ;;  %v498_v6 = vld [vmem:[%s3949_s4] sm:$0x3] }
 0x13c   :  { %824 = vmatprep.mubr.bf16.mxu1 %v2987_v42  ;;  %v3069_v9 = vrot.slane %v498_v6, %v100_v33 }
 0x143   :  { %825 = vmatmul.mubr.bf16.gmra.mrb[68].mxu1 %v2984_v37  ;;  %v3073_v37 = vrot.slane %v498_v6, %v104_v35 }
 0x144   :  { %834 = vmatprep.mubr.bf16.mxu1 %v2999_v8 }
 0x14b   :  { %835 = vmatmul.mubr.bf16.gmra.mrb[72].mxu1 %v2996_v4 }
 0x14c   :  { %844 = vmatprep.mubr.bf16.mxu1 %v3011_v44 }
 0x153   :  { %845 = vmatmul.mubr.bf16.gmra.mrb[76].mxu1 %v3008_v40 }
 0x154   :  { %854 = vmatprep.mubr.bf16.mxu1 %v3023_v13 }
 0x15b   :  { %855 = vmatmul.mubr.bf16.gmra.mrb[80].mxu1 %v3020_v10 }
 0x15c   :  { %864 = vmatprep.mubr.bf16.mxu1 %v3035_v50 }
 0x163   :  { %865 = vmatmul.mubr.bf16.gmra.mrb[84].mxu1 %v3032_v47 }
 0x164   :  { %874 = vmatprep.mubr.bf16.mxu1 %v463_v20 }
 0x16b   :  { %875 = vmatmul.mubr.bf16.gmra.mrb[88].mxu1 %v462_v0 }
 0x16c   :  { %884 = vmatprep.mubr.bf16.mxu1 %v465_v57 }
 0x173   :  { %885 = vmatmul.mubr.bf16.gmra.mrb[92].mxu1 %v464_v56 }
 0x1ce   :  { %v736_v42 = vpop.f32.mrb[32].mxu1 }
 0x1cf   :  { %v737_v4 = vadd.f32 %v736_v42, %v3069_v9  ;;  %v738_v8 = vpop.f32.mrb[33].mxu1 }
 0x1d0   :  { %v739_v40 = vadd.f32 %v738_v8, %v3073_v37  ;;  %v740_v44 = vpop.f32.mrb[34].mxu1 }
 0x1d1   :  { %v741_v10 = vadd.f32 %v740_v44, %v3069_v9  ;;  %v742_v13 = vpop.f32.mrb[35].mxu1  ;;  %v895_v50 = vmax.f32 %v737_v4, 0.0 }
 0x1d2   :  { %v743_v47 = vadd.f32 %v742_v13, %v3073_v37  ;;  %v896_v33 = vmax.f32 %v739_v40, 0.0 }
 0x1d3   :  { %v897_v58 = vmax.f32 %v741_v10, 0.0 }
 0x1d4   :  { %v898_v59 = vmax.f32 %v743_v47, 0.0 }
 0x1d5   :  { %v959_v60 = vpack.c.bf16 %v897_v58, %v895_v50 }
 0x1d6   :  { %v960_v32 = vpack.c.bf16 %v898_v59, %v896_v33  ;;  %v746_v35 = vpop.f32.mrb[36].mxu1 }
 0x1d7   :  { %v747_v61 = vadd.f32 %v746_v35, %v3069_v9  ;;  %v748_v62 = vpop.f32.mrb[37].mxu1 }
 0x1d8   :  { %v749_v63 = vadd.f32 %v748_v62, %v3073_v37  ;;  %v750_v1 = vpop.f32.mrb[38].mxu1  ;;  %1126 = vmatprep.mubr.bf16.mxu0 %v960_v32 }
 0x1d9   :  { %v751_v2 = vadd.f32 %v750_v1, %v3069_v9  ;;  %v752_v3 = vpop.f32.mrb[39].mxu1  ;;  %1127 = vmatmul.mubr.bf16.vlgmr.msra.gmra.mrb[32].mxu0 %v959_v60  ;;  %v899_v7 = vmax.f32 %v747_v61, 0.0 }
 0x1da   :  { %v753_v5 = vadd.f32 %v752_v3, %v3073_v37  ;;  %v900_v12 = vmax.f32 %v749_v63, 0.0 }
 0x1db   :  { %v901_v11 = vmax.f32 %v751_v2, 0.0 }
 0x1dc   :  { %v902_v14 = vmax.f32 %v753_v5, 0.0 }
 0x1dd   :  { %v961_v15 = vpack.c.bf16 %v901_v11, %v899_v7 }
 0x1de   :  { %v962_v16 = vpack.c.bf16 %v902_v14, %v900_v12  ;;  %v756_v17 = vpop.f32.mrb[40].mxu1 }
 0x1df   :  { %v757_v0 = vadd.f32 %v756_v17, %v3069_v9  ;;  %v758_v18 = vpop.f32.mrb[41].mxu1 }
 0x1e0   :  { %1134 = vmatprep.mubr.bf16.mxu0 %v962_v16  ;;  %v759_v19 = vadd.f32 %v758_v18, %v3073_v37  ;;  %v760_v20 = vpop.f32.mrb[42].mxu1 }
 0x1e1   :  { %1135 = vmatmul.mubr.bf16.gmra.mrb[36].mxu0 %v961_v15  ;;  %v903_v21 = vmax.f32 %v757_v0, 0.0  ;;  %v761_v22 = vadd.f32 %v760_v20, %v3069_v9  ;;  %v762_v23 = vpop.f32.mrb[43].mxu1 }
 0x1e2   :  { %v904_v24 = vmax.f32 %v759_v19, 0.0  ;;  %v763_v25 = vadd.f32 %v762_v23, %v3073_v37 }
 0x1e3   :  { %v905_v26 = vmax.f32 %v761_v22, 0.0 }
 0x1e4   :  { %v906_v27 = vmax.f32 %v763_v25, 0.0 }
 0x1e5   :  { %v963_v28 = vpack.c.bf16 %v905_v26, %v903_v21 }
 0x1e6   :  { %v964_v30 = vpack.c.bf16 %v906_v27, %v904_v24  ;;  %v766_v31 = vpop.f32.mrb[44].mxu1 }
 0x1e7   :  { %v767_v34 = vadd.f32 %v766_v31, %v3069_v9  ;;  %v768_v36 = vpop.f32.mrb[45].mxu1 }
 0x1e8   :  { %1142 = vmatprep.mubr.bf16.mxu0 %v964_v30  ;;  %v769_v41 = vadd.f32 %v768_v36, %v3073_v37  ;;  %v770_v43 = vpop.f32.mrb[46].mxu1 }
 0x1e9   :  { %1143 = vmatmul.mubr.bf16.gmra.mrb[40].mxu0 %v963_v28  ;;  %v907_v45 = vmax.f32 %v767_v34, 0.0  ;;  %v771_v46 = vadd.f32 %v770_v43, %v3069_v9  ;;  %v772_v48 = vpop.f32.mrb[47].mxu1 }
 0x1ea   :  { %v908_v49 = vmax.f32 %v769_v41, 0.0  ;;  %v773_v51 = vadd.f32 %v772_v48, %v3073_v37 }
 0x1eb   :  { %v909_v52 = vmax.f32 %v771_v46, 0.0 }
 0x1ec   :  { %v910_v53 = vmax.f32 %v773_v51, 0.0 }
 0x1ed   :  { %v965_v54 = vpack.c.bf16 %v909_v52, %v907_v45 }
 0x1ee   :  { %v966_v55 = vpack.c.bf16 %v910_v53, %v908_v49  ;;  %v776_v56 = vpop.f32.mrb[48].mxu1 }
 0x1ef   :  { %v777_v57 = vadd.f32 %v776_v56, %v3069_v9  ;;  %v778_v38 = vpop.f32.mrb[49].mxu1 }
 0x1f0   :  { %v779_v39 = vadd.f32 %v778_v38, %v3073_v37  ;;  %v780_v6 = vpop.f32.mrb[50].mxu1  ;;  %1150 = vmatprep.mubr.bf16.mxu0 %v966_v55 }
 0x1f1   :  { %v911_v42 = vmax.f32 %v777_v57, 0.0  ;;  %v781_v4 = vadd.f32 %v780_v6, %v3069_v9  ;;  %v782_v8 = vpop.f32.mrb[51].mxu1  ;;  %1151 = vmatmul.mubr.bf16.gmra.mrb[44].mxu0 %v965_v54 }
 0x1f2   :  { %v912_v40 = vmax.f32 %v779_v39, 0.0  ;;  %v783_v44 = vadd.f32 %v782_v8, %v3073_v37 }
 0x1f3   :  { %v913_v10 = vmax.f32 %v781_v4, 0.0 }
 0x1f4   :  { %v914_v13 = vmax.f32 %v783_v44, 0.0 }
 0x1f5   :  { %v967_v47 = vpack.c.bf16 %v913_v10, %v911_v42 }
 0x1f6   :  { %v968_v50 = vpack.c.bf16 %v914_v13, %v912_v40  ;;  %v786_v58 = vpop.f32.mrb[52].mxu1 }
 0x1f7   :  { %v787_v33 = vadd.f32 %v786_v58, %v3069_v9  ;;  %v788_v59 = vpop.f32.mrb[53].mxu1 }
 0x1f8   :  { %v789_v60 = vadd.f32 %v788_v59, %v3073_v37  ;;  %v790_v32 = vpop.f32.mrb[54].mxu1  ;;  %1158 = vmatprep.mubr.bf16.mxu0 %v968_v50 }
 0x1f9   :  { %v915_v35 = vmax.f32 %v787_v33, 0.0  ;;  %v791_v61 = vadd.f32 %v790_v32, %v3069_v9  ;;  %v792_v62 = vpop.f32.mrb[55].mxu1  ;;  %1159 = vmatmul.mubr.bf16.gmra.mrb[48].mxu0 %v967_v47 }
 0x1fa   :  { %v916_v63 = vmax.f32 %v789_v60, 0.0  ;;  %v793_v1 = vadd.f32 %v792_v62, %v3073_v37 }
 0x1fb   :  { %v917_v2 = vmax.f32 %v791_v61, 0.0 }
 0x1fc   :  { %v918_v3 = vmax.f32 %v793_v1, 0.0 }
 0x1fd   :  { %v969_v5 = vpack.c.bf16 %v917_v2, %v915_v35 }
 0x1fe   :  { %v970_v7 = vpack.c.bf16 %v918_v3, %v916_v63  ;;  %v796_v11 = vpop.f32.mrb[56].mxu1 }
 0x1ff   :  { %v797_v12 = vadd.f32 %v796_v11, %v3069_v9  ;;  %v798_v14 = vpop.f32.mrb[57].mxu1 }
 0x200   :  { %v799_v15 = vadd.f32 %v798_v14, %v3073_v37  ;;  %v800_v16 = vpop.f32.mrb[58].mxu1  ;;  %1166 = vmatprep.mubr.bf16.mxu0 %v970_v7 }
 0x201   :  { %v919_v17 = vmax.f32 %v797_v12, 0.0  ;;  %v801_v0 = vadd.f32 %v800_v16, %v3069_v9  ;;  %v802_v18 = vpop.f32.mrb[59].mxu1  ;;  %1167 = vmatmul.mubr.bf16.gmra.mrb[52].mxu0 %v969_v5 }
 0x202   :  { %v920_v19 = vmax.f32 %v799_v15, 0.0  ;;  %v803_v20 = vadd.f32 %v802_v18, %v3073_v37 }
 0x203   :  { %v921_v21 = vmax.f32 %v801_v0, 0.0 }
 0x204   :  { %v922_v22 = vmax.f32 %v803_v20, 0.0 }
 0x205   :  { %v971_v23 = vpack.c.bf16 %v921_v21, %v919_v17 }
 0x206   :  { %v972_v24 = vpack.c.bf16 %v922_v22, %v920_v19  ;;  %v806_v25 = vpop.f32.mrb[60].mxu1 }
 0x207   :  { %v807_v26 = vadd.f32 %v806_v25, %v3069_v9  ;;  %v808_v27 = vpop.f32.mrb[61].mxu1 }
 0x208   :  { %v809_v28 = vadd.f32 %v808_v27, %v3073_v37  ;;  %v810_v30 = vpop.f32.mrb[62].mxu1  ;;  %1174 = vmatprep.mubr.bf16.mxu0 %v972_v24 }
 0x209   :  { %v923_v31 = vmax.f32 %v807_v26, 0.0  ;;  %v811_v34 = vadd.f32 %v810_v30, %v3069_v9  ;;  %v812_v36 = vpop.f32.mrb[63].mxu1  ;;  %1175 = vmatmul.mubr.bf16.gmra.mrb[56].mxu0 %v971_v23 }
 0x20a   :  { %v924_v41 = vmax.f32 %v809_v28, 0.0  ;;  %v813_v43 = vadd.f32 %v812_v36, %v3073_v37 }
 0x20b   :  { %v925_v45 = vmax.f32 %v811_v34, 0.0 }
 0x20c   :  { %v926_v46 = vmax.f32 %v813_v43, 0.0 }
 0x20d   :  { %v973_v48 = vpack.c.bf16 %v925_v45, %v923_v31 }
 0x20e   :  { %v974_v49 = vpack.c.bf16 %v926_v46, %v924_v41  ;;  %v816_v51 = vpop.f32.mrb[64].mxu1 }
 0x20f   :  { %v817_v52 = vadd.f32 %v816_v51, %v3069_v9  ;;  %v818_v53 = vpop.f32.mrb[65].mxu1 }
 0x210   :  { %v819_v54 = vadd.f32 %v818_v53, %v3073_v37  ;;  %v820_v55 = vpop.f32.mrb[66].mxu1  ;;  %1182 = vmatprep.mubr.bf16.mxu0 %v974_v49 }
 0x211   :  { %v927_v56 = vmax.f32 %v817_v52, 0.0  ;;  %v821_v57 = vadd.f32 %v820_v55, %v3069_v9  ;;  %v822_v38 = vpop.f32.mrb[67].mxu1  ;;  %1183 = vmatmul.mubr.bf16.gmra.mrb[60].mxu0 %v973_v48 }
 0x212   :  { %v928_v39 = vmax.f32 %v819_v54, 0.0  ;;  %v823_v6 = vadd.f32 %v822_v38, %v3073_v37 }
 0x213   :  { %v929_v42 = vmax.f32 %v821_v57, 0.0 }
 0x214   :  { %v930_v4 = vmax.f32 %v823_v6, 0.0 }
 0x215   :  { %v975_v8 = vpack.c.bf16 %v929_v42, %v927_v56 }
 0x216   :  { %v976_v40 = vpack.c.bf16 %v930_v4, %v928_v39  ;;  %v826_v44 = vpop.f32.mrb[68].mxu1 }
 0x217   :  { %v827_v10 = vadd.f32 %v826_v44, %v3069_v9  ;;  %v828_v13 = vpop.f32.mrb[69].mxu1 }
 0x218   :  { %v829_v47 = vadd.f32 %v828_v13, %v3073_v37  ;;  %v830_v50 = vpop.f32.mrb[70].mxu1  ;;  %1190 = vmatprep.mubr.bf16.mxu0 %v976_v40 }
 0x219   :  { %v931_v58 = vmax.f32 %v827_v10, 0.0  ;;  %v831_v33 = vadd.f32 %v830_v50, %v3069_v9  ;;  %v832_v59 = vpop.f32.mrb[71].mxu1  ;;  %1191 = vmatmul.mubr.bf16.gmra.mrb[64].mxu0 %v975_v8 }
 0x21a   :  { %v932_v60 = vmax.f32 %v829_v47, 0.0  ;;  %v833_v32 = vadd.f32 %v832_v59, %v3073_v37 }
 0x21b   :  { %v933_v35 = vmax.f32 %v831_v33, 0.0 }
 0x21c   :  { %v934_v61 = vmax.f32 %v833_v32, 0.0 }
 0x21d   :  { %v977_v62 = vpack.c.bf16 %v933_v35, %v931_v58 }
 0x21e   :  { %v978_v63 = vpack.c.bf16 %v934_v61, %v932_v60  ;;  %v836_v1 = vpop.f32.mrb[72].mxu1 }
 0x21f   :  { %v837_v2 = vadd.f32 %v836_v1, %v3069_v9  ;;  %v838_v3 = vpop.f32.mrb[73].mxu1 }
 0x220   :  { %v839_v5 = vadd.f32 %v838_v3, %v3073_v37  ;;  %v840_v7 = vpop.f32.mrb[74].mxu1  ;;  %1198 = vmatprep.mubr.bf16.mxu0 %v978_v63 }
 0x221   :  { %v935_v11 = vmax.f32 %v837_v2, 0.0  ;;  %v841_v12 = vadd.f32 %v840_v7, %v3069_v9  ;;  %v842_v14 = vpop.f32.mrb[75].mxu1  ;;  %1199 = vmatmul.mubr.bf16.gmra.mrb[68].mxu0 %v977_v62 }
 0x222   :  { %v936_v15 = vmax.f32 %v839_v5, 0.0  ;;  %v843_v16 = vadd.f32 %v842_v14, %v3073_v37 }
 0x223   :  { %v937_v17 = vmax.f32 %v841_v12, 0.0 }
 0x224   :  { %v938_v0 = vmax.f32 %v843_v16, 0.0 }
 0x225   :  { %v979_v18 = vpack.c.bf16 %v937_v17, %v935_v11 }
 0x226   :  { %v980_v19 = vpack.c.bf16 %v938_v0, %v936_v15  ;;  %v846_v20 = vpop.f32.mrb[76].mxu1 }
 0x227   :  { %v847_v21 = vadd.f32 %v846_v20, %v3069_v9  ;;  %v848_v22 = vpop.f32.mrb[77].mxu1 }
 0x228   :  { %v849_v23 = vadd.f32 %v848_v22, %v3073_v37  ;;  %v850_v24 = vpop.f32.mrb[78].mxu1  ;;  %1206 = vmatprep.mubr.bf16.mxu0 %v980_v19 }
 0x229   :  { %v939_v25 = vmax.f32 %v847_v21, 0.0  ;;  %v851_v26 = vadd.f32 %v850_v24, %v3069_v9  ;;  %v852_v27 = vpop.f32.mrb[79].mxu1  ;;  %1207 = vmatmul.mubr.bf16.gmra.mrb[72].mxu0 %v979_v18 }
 0x22a   :  { %v940_v28 = vmax.f32 %v849_v23, 0.0  ;;  %v853_v30 = vadd.f32 %v852_v27, %v3073_v37 }
 0x22b   :  { %v941_v31 = vmax.f32 %v851_v26, 0.0 }
 0x22c   :  { %v942_v34 = vmax.f32 %v853_v30, 0.0 }
 0x22d   :  { %v981_v36 = vpack.c.bf16 %v941_v31, %v939_v25 }
 0x22e   :  { %v982_v41 = vpack.c.bf16 %v942_v34, %v940_v28  ;;  %v856_v43 = vpop.f32.mrb[80].mxu1  ;;  %v3142_v34 = vld [vmem:[%s3951_s6] ss:$0 sm:$0xff] }
 0x22f   :  { %v857_v45 = vadd.f32 %v856_v43, %v3069_v9  ;;  %v858_v46 = vpop.f32.mrb[81].mxu1 }
 0x230   :  { %v859_v48 = vadd.f32 %v858_v46, %v3073_v37  ;;  %v860_v49 = vpop.f32.mrb[82].mxu1  ;;  %1214 = vmatprep.mubr.bf16.mxu0 %v982_v41 }
 0x231   :  { %v943_v51 = vmax.f32 %v857_v45, 0.0  ;;  %v861_v52 = vadd.f32 %v860_v49, %v3069_v9  ;;  %v862_v53 = vpop.f32.mrb[83].mxu1  ;;  %1215 = vmatmul.mubr.bf16.gmra.mrb[76].mxu0 %v981_v36 }
 0x232   :  { %v944_v54 = vmax.f32 %v859_v48, 0.0  ;;  %v863_v55 = vadd.f32 %v862_v53, %v3073_v37 }
 0x233   :  { %v945_v56 = vmax.f32 %v861_v52, 0.0 }
 0x234   :  { %v946_v57 = vmax.f32 %v863_v55, 0.0 }
 0x235   :  { %v983_v38 = vpack.c.bf16 %v945_v56, %v943_v51 }
 0x236   :  { %v984_v39 = vpack.c.bf16 %v946_v57, %v944_v54  ;;  %v866_v6 = vpop.f32.mrb[84].mxu1 }
 0x237   :  { %v867_v42 = vadd.f32 %v866_v6, %v3069_v9  ;;  %v868_v4 = vpop.f32.mrb[85].mxu1 }
 0x238   :  { %v869_v8 = vadd.f32 %v868_v4, %v3073_v37  ;;  %v870_v40 = vpop.f32.mrb[86].mxu1  ;;  %1222 = vmatprep.mubr.bf16.mxu0 %v984_v39 }
 0x239   :  { %v947_v44 = vmax.f32 %v867_v42, 0.0  ;;  %v871_v10 = vadd.f32 %v870_v40, %v3069_v9  ;;  %v872_v13 = vpop.f32.mrb[87].mxu1  ;;  %1223 = vmatmul.mubr.bf16.gmra.mrb[80].mxu0 %v983_v38 }
 0x23a   :  { %v948_v47 = vmax.f32 %v869_v8, 0.0  ;;  %v873_v50 = vadd.f32 %v872_v13, %v3073_v37  ;;  %v3157_v13 = vand.u32 127, %v98_v29 }
 0x23b   :  { %v949_v58 = vmax.f32 %v871_v10, 0.0 }
 0x23c   :  { %v950_v33 = vmax.f32 %v873_v50, 0.0  ;;  %vm1257_vm1 = vcmp.lt.s32.totalorder %v3157_v13, 8 }
 0x23d   :  { %v985_v59 = vpack.c.bf16 %v949_v58, %v947_v44 }
 0x23e   :  { %v986_v60 = vpack.c.bf16 %v950_v33, %v948_v47  ;;  %v876_v32 = vpop.f32.mrb[88].mxu1 }
 0x23f   :  { %v877_v35 = vadd.f32 %v876_v32, %v3069_v9  ;;  %v878_v61 = vpop.f32.mrb[89].mxu1 }
 0x240   :  { %v879_v62 = vadd.f32 %v878_v61, %v3073_v37  ;;  %v880_v63 = vpop.f32.mrb[90].mxu1  ;;  %1230 = vmatprep.mubr.bf16.mxu0 %v986_v60 }
 0x241   :  { %v951_v1 = vmax.f32 %v877_v35, 0.0  ;;  %v881_v2 = vadd.f32 %v880_v63, %v3069_v9  ;;  %v882_v3 = vpop.f32.mrb[91].mxu1  ;;  %1231 = vmatmul.mubr.bf16.gmra.mrb[84].mxu0 %v985_v59 }
 0x242   :  { %v952_v5 = vmax.f32 %v879_v62, 0.0  ;;  %v883_v7 = vadd.f32 %v882_v3, %v3073_v37 }
 0x243   :  { %v953_v11 = vmax.f32 %v881_v2, 0.0 }
 0x244   :  { %v954_v12 = vmax.f32 %v883_v7, 0.0 }
 0x245   :  { %v987_v14 = vpack.c.bf16 %v953_v11, %v951_v1 }
 0x246   :  { %v988_v15 = vpack.c.bf16 %v954_v12, %v952_v5  ;;  %v886_v16 = vpop.f32.mrb[92].mxu1 }
 0x247   :  { %v887_v17 = vadd.f32 %v886_v16, %v3069_v9  ;;  %v888_v0 = vpop.f32.mrb[93].mxu1 }
 0x248   :  { %v889_v18 = vadd.f32 %v888_v0, %v3073_v37  ;;  %v890_v19 = vpop.f32.mrb[94].mxu1  ;;  %1238 = vmatprep.mubr.bf16.mxu0 %v988_v15 }
 0x249   :  { %v955_v20 = vmax.f32 %v887_v17, 0.0  ;;  %v891_v21 = vadd.f32 %v890_v19, %v3069_v9  ;;  %v892_v22 = vpop.f32.mrb[95].mxu1  ;;  %1239 = vmatmul.mubr.bf16.gmra.mrb[88].mxu0 %v987_v14 }
 0x24a   :  { %v956_v23 = vmax.f32 %v889_v18, 0.0  ;;  %v893_v24 = vadd.f32 %v892_v22, %v3073_v37 }
 0x24b   :  { %v957_v25 = vmax.f32 %v891_v21, 0.0 }
 0x24c   :  { %v958_v26 = vmax.f32 %v893_v24, 0.0 }
 0x24d   :  { %v989_v27 = vpack.c.bf16 %v957_v25, %v955_v20 }
 0x24e   :  { %v990_v28 = vpack.c.bf16 %v958_v26, %v956_v23 }
 0x250   :  { %1246 = vmatprep.mubr.bf16.mxu0 %v990_v28 }
 0x251   :  { %1247 = vmatmul.mubr.bf16.gmra.mrb[92].mxu0 %v989_v27 }
 0x2ac   :  { %v2294_v30 = vpop.f32.mrb[32].mxu0 }
 0x2ad   :  { %v2295_v31 = vpop.f32.mrb[33].mxu0 }
 0x2ae   :  { %v2296_v36 = vadd.f32 %v2295_v31, %v2294_v30  ;;  %v2297_v9 = vpop.f32.mrb[34].mxu0 }
 0x2af   :  { %v2298_v41 = vpop.f32.mrb[35].mxu0 }
 0x2b0   :  { %v2299_v43 = vadd.f32 %v2298_v41, %v2297_v9  ;;  %v1129_v45 = vadd.f32 %v2296_v36, %v3142_v34 }
 0x2b2   :  { %1900 = vrot.lane.b32.xlu0 %v1129_v45, %s2650_s5  ;;  %v1132_v37 = vadd.f32 %v2299_v43, %v3142_v34  ;;  %v3164_v60 = vsel %vm1257_vm1, %v1129_v45, -1e+30 }
 0x2b4   :  { %v2300_v46 = vpop.f32.mrb[36].mxu0  ;;  %1902 = vrot.lane.b32.xlu1 %v1132_v37, %s2650_s5  ;;  %v3171_v29 = vsel %vm1257_vm1, %v1132_v37, -1e+30 }
 0x2b5   :  { %v2301_v48 = vpop.f32.mrb[37].mxu0 }
 0x2b6   :  { %v2302_v49 = vadd.f32 %v2301_v48, %v2300_v46  ;;  %v2303_v51 = vpop.f32.mrb[38].mxu0 }
 0x2b7   :  { %v2304_v52 = vpop.f32.mrb[39].mxu0 }
 0x2b8   :  { %v1137_v53 = vadd.f32 %v2302_v49, %v3142_v34  ;;  %v2305_v54 = vadd.f32 %v2304_v52, %v2303_v51 }
 0x2ba   :  { %1904 = vrot.lane.b32.xlu1 %v1137_v53, %s2650_s5  ;;  %v3180_v5 = vsel %vm1257_vm1, %v1137_v53, -1e+30  ;;  %v1140_v23 = vadd.f32 %v2305_v54, %v3142_v34 }
 0x2bc   :  { %v2306_v55 = vpop.f32.mrb[40].mxu0 }
 0x2bd   :  { %v2307_v56 = vpop.f32.mrb[41].mxu0 }
 0x2be   :  { %v2308_v57 = vadd.f32 %v2307_v56, %v2306_v55  ;;  %v2309_v38 = vpop.f32.mrb[42].mxu0 }
 0x2bf   :  { %v2310_v39 = vpop.f32.mrb[43].mxu0 }
 0x2c0   :  { %v3150_v6 = vadd.f32 %v2310_v39, %v2309_v38  ;;  %v1145_v19 = vadd.f32 %v2308_v57, %v3142_v34 }
 0x2c2   :  { %v3211_v56 = vsel %vm1257_vm1, %v1145_v19, -1e+30 }
 0x2c4   :  { %v2312_v42 = vpop.f32.mrb[44].mxu0 }
 0x2c5   :  { %v2313_v4 = vpop.f32.mrb[45].mxu0 }
 0x2c6   :  { %v3152_v8 = vadd.f32 %v2313_v4, %v2312_v42  ;;  %v2315_v40 = vpop.f32.mrb[46].mxu0 }
 0x2c7   :  { %v2316_v44 = vpop.f32.mrb[47].mxu0 }
 0x2c8   :  { %v3154_v10 = vadd.f32 %v2316_v44, %v2315_v40 }
 0x2cc   :  { %v2318_v47 = vpop.f32.mrb[48].mxu0 }
 0x2cd   :  { %v2319_v50 = vpop.f32.mrb[49].mxu0 }
 0x2ce   :  { %v3160_v58 = vadd.f32 %v2319_v50, %v2318_v47  ;;  %v2321_v33 = vpop.f32.mrb[50].mxu0  ;;  %v3222_v50 = vsel %vm1257_vm1, %v1140_v23, -1e+30 }
 0x2cf   :  { %v2322_v59 = vpop.f32.mrb[51].mxu0 }
 0x2d0   :  { %v3166_v32 = vadd.f32 %v2322_v59, %v2321_v33 }
 0x2d1   :  { %1292 = vmax.xlane.f32.xlu0 %v3164_v60 }
 0x2d4   :  { %v2324_v35 = vpop.f32.mrb[52].mxu0 }
 0x2d5   :  { %1294 = vmax.xlane.f32.xlu0 %v3171_v29  ;;  %v2325_v61 = vpop.f32.mrb[53].mxu0 }
 0x2d6   :  { %v3174_v62 = vadd.f32 %v2325_v61, %v2324_v35  ;;  %v2327_v63 = vpop.f32.mrb[54].mxu0 }
 0x2d7   :  { %v2328_v1 = vpop.f32.mrb[55].mxu0 }
 0x2d8   :  { %v3176_v2 = vadd.f32 %v2328_v1, %v2327_v63 }
 0x2dc   :  { %v2330_v3 = vpop.f32.mrb[56].mxu0 }
 0x2dd   :  { %v2331_v7 = vpop.f32.mrb[57].mxu0 }
 0x2de   :  { %1296 = vmax.xlane.f32.xlu1 %v3180_v5  ;;  %v3183_v11 = vadd.f32 %v2331_v7, %v2330_v3  ;;  %v2333_v12 = vpop.f32.mrb[58].mxu0  ;;  %v1153_v3 = vadd.f32 %v3152_v8, %v3142_v34 }
 0x2df   :  { %v2334_v14 = vpop.f32.mrb[59].mxu0 }
 0x2e0   :  { %v3185_v15 = vadd.f32 %v2334_v14, %v2333_v12 }
 0x2e4   :  { %v2336_v16 = vpop.f32.mrb[60].mxu0 }
 0x2e5   :  { %v2337_v17 = vpop.f32.mrb[61].mxu0 }
 0x2e6   :  { %v3187_v0 = vadd.f32 %v2337_v17, %v2336_v16  ;;  %v2339_v18 = vpop.f32.mrb[62].mxu0 }
 0x2e7   :  { %v2340_v20 = vpop.f32.mrb[63].mxu0 }
 0x2e8   :  { %v3190_v21 = vadd.f32 %v2340_v20, %v2339_v18 }
 0x2eb   :  { %1908 = vrot.lane.b32.xlu0 %v1145_v19, %s2650_s5  ;;  %v1148_v19 = vadd.f32 %v3150_v6, %v3142_v34 }
 0x2ec   :  { %v2342_v22 = vpop.f32.mrb[64].mxu0 }
 0x2ed   :  { %v2343_v24 = vpop.f32.mrb[65].mxu0 }
 0x2ee   :  { %v3194_v25 = vadd.f32 %v2343_v24, %v2342_v22  ;;  %v2345_v26 = vpop.f32.mrb[66].mxu0 }
 0x2ef   :  { %1906 = vrot.lane.b32.xlu1 %v1140_v23, %s2650_s5  ;;  %v2346_v27 = vpop.f32.mrb[67].mxu0 }
 0x2f0   :  { %v3197_v28 = vadd.f32 %v2346_v27, %v2345_v26 }
 0x2f4   :  { %v2348_v30 = vpop.f32.mrb[68].mxu0 }
 0x2f5   :  { %v2349_v31 = vpop.f32.mrb[69].mxu0 }
 0x2f6   :  { %v3199_v36 = vadd.f32 %v2349_v31, %v2348_v30  ;;  %v2351_v9 = vpop.f32.mrb[70].mxu0  ;;  %v3257_v31 = vsel %vm1257_vm1, %v1153_v3, -1e+30 }
 0x2f7   :  { %v2352_v41 = vpop.f32.mrb[71].mxu0 }
 0x2f8   :  { %v3201_v43 = vadd.f32 %v2352_v41, %v2351_v9  ;;  %v3262_v9 = vsel %vm1257_vm1, %v1148_v19, -1e+30  ;;  %v1161_v41 = vadd.f32 %v3160_v58, %v3142_v34 }
 0x2fc   :  { %v2354_v45 = vpop.f32.mrb[72].mxu0 }
 0x2fd   :  { %v2355_v37 = vpop.f32.mrb[73].mxu0 }
 0x2fe   :  { %v3203_v46 = vadd.f32 %v2355_v37, %v2354_v45  ;;  %v2357_v48 = vpop.f32.mrb[74].mxu0  ;;  %v1156_v45 = vadd.f32 %v3154_v10, %v3142_v34  ;;  %v3287_v10 = vsel %vm1257_vm1, %v1161_v41, -1e+30 }
 0x2ff   :  { %v2358_v49 = vpop.f32.mrb[75].mxu0 }
 0x300   :  { %v3205_v51 = vadd.f32 %v2358_v49, %v2357_v48 }
 0x304   :  { %v2360_v52 = vpop.f32.mrb[76].mxu0 }
 0x305   :  { %v2361_v53 = vpop.f32.mrb[77].mxu0 }
 0x306   :  { %v3207_v54 = vadd.f32 %v2361_v53, %v2360_v52  ;;  %v2363_v55 = vpop.f32.mrb[78].mxu0  ;;  %v3292_v53 = vsel %vm1257_vm1, %v1156_v45, -1e+30 }
 0x307   :  { %v2364_v57 = vpop.f32.mrb[79].mxu0 }
 0x308   :  { %v3213_v38 = vadd.f32 %v2364_v57, %v2363_v55  ;;  %v1169_v55 = vadd.f32 %v3174_v62, %v3142_v34  ;;  %v1164_v57 = vadd.f32 %v3166_v32, %v3142_v34 }
 0x30a   :  { %1300 = vmax.xlane.f32.xlu0 %v3211_v56  ;;  %v3315_v32 = vsel %vm1257_vm1, %v1169_v55, -1e+30  ;;  %v3320_v62 = vsel %vm1257_vm1, %v1164_v57, -1e+30 }
 0x30c   :  { %v2366_v39 = vpop.f32.mrb[80].mxu0 }
 0x30d   :  { %v2367_v42 = vpop.f32.mrb[81].mxu0 }
 0x30e   :  { %v3216_v4 = vadd.f32 %v2367_v42, %v2366_v39  ;;  %v2369_v40 = vpop.f32.mrb[82].mxu0 }
 0x30f   :  { %v2370_v44 = vpop.f32.mrb[83].mxu0 }
 0x310   :  { %v3218_v47 = vadd.f32 %v2370_v44, %v2369_v40 }
 0x313   :  { %1298 = vmax.xlane.f32.xlu1 %v3222_v50 }
 0x314   :  { %v2372_v33 = vpop.f32.mrb[84].mxu0 }
 0x315   :  { %v2373_v59 = vpop.f32.mrb[85].mxu0 }
 0x316   :  { %v3225_v35 = vadd.f32 %v2373_v59, %v2372_v33  ;;  %v2375_v61 = vpop.f32.mrb[86].mxu0  ;;  %v1177_v33 = vadd.f32 %v3183_v11, %v3142_v34  ;;  %v1172_v59 = vadd.f32 %v3176_v2, %v3142_v34 }
 0x317   :  { %v2376_v63 = vpop.f32.mrb[87].mxu0 }
 0x318   :  { %v3227_v1 = vadd.f32 %v2376_v63, %v2375_v61  ;;  %v3343_v2 = vsel %vm1257_vm1, %v1177_v33, -1e+30  ;;  %v3348_v11 = vsel %vm1257_vm1, %v1172_v59, -1e+30 }
 0x31c   :  { %v2378_v7 = vpop.f32.mrb[88].mxu0 }
 0x31d   :  { %v2379_v12 = vpop.f32.mrb[89].mxu0 }
 0x31e   :  { %v3231_v14 = vadd.f32 %v2379_v12, %v2378_v7  ;;  %v2381_v16 = vpop.f32.mrb[90].mxu0  ;;  %v1185_v12 = vadd.f32 %v3187_v0, %v3142_v34 }
 0x31f   :  { %v2382_v17 = vpop.f32.mrb[91].mxu0 }
 0x320   :  { %1912 = vrot.lane.b32.xlu0 %v1153_v3, %s2650_s5  ;;  %v3234_v18 = vadd.f32 %v2382_v17, %v2381_v16  ;;  %v1180_v16 = vadd.f32 %v3185_v15, %v3142_v34  ;;  %v3371_v15 = vsel %vm1257_vm1, %v1185_v12, -1e+30 }
 0x322   :  { %v3376_v0 = vsel %vm1257_vm1, %v1180_v16, -1e+30 }
 0x324   :  { %1910 = vrot.lane.b32.xlu1 %v1148_v19, %s2650_s5  ;;  %v1901_v20 = vpop.permute.xlu0 %1900  ;;  %v2384_v22 = vpop.f32.mrb[92].mxu0 }
 0x325   :  { %1997 = vst.msk [vmem:[%s3953_s8] sm:$0xff] %vm1996_vm2, %v1901_v20  ;;  %v2385_v8 = vpop.f32.mrb[93].mxu0 }
 0x326   :  { %v1903_v23 = vpop.permute.xlu1 %1902  ;;  %v3243_v24 = vadd.f32 %v2385_v8, %v2384_v22  ;;  %v2387_v26 = vpop.f32.mrb[94].mxu0  ;;  %v1193_v8 = vadd.f32 %v3194_v25, %v3142_v34 }
 0x327   :  { %1998 = vst.msk [vmem:[%s3953_s8 + $0x8] sm:$0xff] %vm1996_vm2, %v1903_v23  ;;  %v2388_v6 = vpop.f32.mrb[95].mxu0  ;;  %v1188_v23 = vadd.f32 %v3190_v21, %v3142_v34 }
 0x328   :  { %v3249_v27 = vadd.f32 %v2388_v6, %v2387_v26  ;;  %v3399_v21 = vsel %vm1257_vm1, %v1193_v8, -1e+30 }
 0x329   :  { %v3404_v25 = vsel %vm1257_vm1, %v1188_v23, -1e+30 }
 0x32c   :  { %v1905_v30 = vpop.permute.xlu1 %1904 }
 0x32d   :  { %1999 = vst.msk [vmem:[%s3953_s8 + $0x10] sm:$0xff] %vm1996_vm2, %v1905_v30 }
 0x33f   :  { %1304 = vmax.xlane.f32.xlu0 %v3257_v31 }
 0x348   :  { %1302 = vmax.xlane.f32.xlu1 %v3262_v9 }
 0x355   :  { %1916 = vrot.lane.b32.xlu0 %v1161_v41, %s2650_s5 }
 0x359   :  { %1914 = vrot.lane.b32.xlu1 %v1156_v45, %s2650_s5  ;;  %v1201_v45 = vadd.f32 %v3199_v36, %v3142_v34 }
 0x35e   :  { %v3271_v37 = vpop.xlane.xlu0 %1292 }
 0x362   :  { %v3273_v48 = vpop.xlane.xlu0 %1294 }
 0x366   :  { %v1909_v49 = vpop.permute.xlu0 %1908 }
 0x367   :  { %2001 = vst.msk [vmem:[%s3953_s8 + $0x20] sm:$0xff] %vm1996_vm2, %v1909_v49  ;;  %v1196_v49 = vadd.f32 %v3197_v28, %v3142_v34  ;;  %v3427_v28 = vsel %vm1257_vm1, %v1201_v45, -1e+30 }
 0x369   :  { %v3432_v36 = vsel %vm1257_vm1, %v1196_v49, -1e+30 }
 0x36b   :  { %v3279_v52 = vpop.xlane.xlu1 %1296 }
 0x36f   :  { %v1907_v58 = vpop.permute.xlu1 %1906 }
 0x370   :  { %2000 = vst.msk [vmem:[%s3953_s8 + $0x18] sm:$0xff] %vm1996_vm2, %v1907_v58 }
 0x374   :  { %1308 = vmax.xlane.f32.xlu0 %v3287_v10 }
 0x37d   :  { %1306 = vmax.xlane.f32.xlu1 %v3292_v53 }
 0x38a   :  { %1920 = vrot.lane.b32.xlu0 %v1169_v55, %s2650_s5 }
 0x38e   :  { %1918 = vrot.lane.b32.xlu1 %v1164_v57, %s2650_s5 }
 0x397   :  { %v3301_v39 = vpop.xlane.xlu0 %1300 }
 0x39b   :  { %v1913_v42 = vpop.permute.xlu0 %1912 }
 0x39c   :  { %2003 = vst.msk [vmem:[%s3953_s8 + $0x30] sm:$0xff] %vm1996_vm2, %v1913_v42 }
 0x3a0   :  { %v3307_v40 = vpop.xlane.xlu1 %1298 }
 0x3a4   :  { %v1911_v44 = vpop.permute.xlu1 %1910 }
 0x3a5   :  { %2002 = vst.msk [vmem:[%s3953_s8 + $0x28] sm:$0xff] %vm1996_vm2, %v1911_v44  ;;  %v1209_v44 = vadd.f32 %v3203_v46, %v3142_v34 }
 0x3a9   :  { %1312 = vmax.xlane.f32.xlu0 %v3315_v32 }
 0x3b2   :  { %1310 = vmax.xlane.f32.xlu1 %v3320_v62 }
 0x3bf   :  { %1924 = vrot.lane.b32.xlu0 %v1177_v33, %s2650_s5  ;;  %v1204_v33 = vadd.f32 %v3201_v43, %v3142_v34  ;;  %v3455_v43 = vsel %vm1257_vm1, %v1209_v44, -1e+30 }
 0x3c1   :  { %v3460_v46 = vsel %vm1257_vm1, %v1204_v33, -1e+30 }
 0x3c3   :  { %1922 = vrot.lane.b32.xlu1 %v1172_v59, %s2650_s5 }
 0x3cc   :  { %v3329_v61 = vpop.xlane.xlu0 %1304 }
 0x3d0   :  { %v1917_v63 = vpop.permute.xlu0 %1916 }
 0x3d1   :  { %2005 = vst.msk [vmem:[%s3953_s8 + $0x40] sm:$0xff] %vm1996_vm2, %v1917_v63 }
 0x3d5   :  { %v3335_v3 = vpop.xlane.xlu1 %1302 }
 0x3d9   :  { %v1915_v7 = vpop.permute.xlu1 %1914 }
 0x3da   :  { %2004 = vst.msk [vmem:[%s3953_s8 + $0x38] sm:$0xff] %vm1996_vm2, %v1915_v7 }
 0x3de   :  { %1316 = vmax.xlane.f32.xlu0 %v3343_v2 }
 0x3e7   :  { %1314 = vmax.xlane.f32.xlu1 %v3348_v11 }
 0x3f4   :  { %1928 = vrot.lane.b32.xlu0 %v1185_v12, %s2650_s5 }
 0x3f8   :  { %1926 = vrot.lane.b32.xlu1 %v1180_v16, %s2650_s5  ;;  %v1217_v16 = vadd.f32 %v3207_v54, %v3142_v34  ;;  %v1225_v54 = vadd.f32 %v3216_v4, %v3142_v34  ;;  %v3504_v4 = vadd.f32 %v3231_v14, %v3142_v34 }
 0x401   :  { %v3357_v17 = vpop.xlane.xlu0 %1308 }
 0x405   :  { %v1921_v19 = vpop.permute.xlu0 %1920 }
 0x406   :  { %2007 = vst.msk [vmem:[%s3953_s8 + $0x50] sm:$0xff] %vm1996_vm2, %v1921_v19  ;;  %v1212_v19 = vadd.f32 %v3205_v51, %v3142_v34  ;;  %v3483_v51 = vsel %vm1257_vm1, %v1217_v16, -1e+30 }
 0x40a   :  { %v3363_v20 = vpop.xlane.xlu1 %1306 }
 0x40e   :  { %v1919_v22 = vpop.permute.xlu1 %1918 }
 0x40f   :  { %2006 = vst.msk [vmem:[%s3953_s8 + $0x48] sm:$0xff] %vm1996_vm2, %v1919_v22 }
 0x413   :  { %1320 = vmax.xlane.f32.xlu0 %v3371_v15 }
 0x41c   :  { %1318 = vmax.xlane.f32.xlu1 %v3376_v0 }
 0x429   :  { %1932 = vrot.lane.b32.xlu0 %v1193_v8, %s2650_s5 }
 0x42d   :  { %1930 = vrot.lane.b32.xlu1 %v1188_v23, %s2650_s5 }
 0x436   :  { %v3385_v26 = vpop.xlane.xlu0 %1312 }
 0x43a   :  { %v1925_v6 = vpop.permute.xlu0 %1924 }
 0x43b   :  { %2009 = vst.msk [vmem:[%s3953_s8 + $0x60] sm:$0xff] %vm1996_vm2, %v1925_v6 }
 0x43f   :  { %v3391_v30 = vpop.xlane.xlu1 %1310 }
 0x443   :  { %v1923_v41 = vpop.permute.xlu1 %1922 }
 0x444   :  { %2008 = vst.msk [vmem:[%s3953_s8 + $0x58] sm:$0xff] %vm1996_vm2, %v1923_v41  ;;  %v3490_v41 = vsel %vm1257_vm1, %v1225_v54, -1e+30 }
 0x448   :  { %1324 = vmax.xlane.f32.xlu0 %v3399_v21 }
 0x451   :  { %1322 = vmax.xlane.f32.xlu1 %v3404_v25 }
 0x45e   :  { %1936 = vrot.lane.b32.xlu0 %v1201_v45, %s2650_s5  ;;  %v3494_v45 = vadd.f32 %v3225_v35, %v3142_v34  ;;  %v3515_v35 = vsel %vm1257_vm1, %v3504_v4, -1e+30 }
 0x462   :  { %1934 = vrot.lane.b32.xlu1 %v1196_v49, %s2650_s5  ;;  %v3500_v49 = vsel %vm1257_vm1, %v3494_v45, -1e+30 }
 0x46b   :  { %v3413_v58 = vpop.xlane.xlu0 %1316 }
 0x46f   :  { %v1929_v55 = vpop.permute.xlu0 %1928 }
 0x470   :  { %2011 = vst.msk [vmem:[%s3953_s8 + $0x70] sm:$0xff] %vm1996_vm2, %v1929_v55  ;;  %v3509_v55 = vsel %vm1257_vm1, %v1212_v19, -1e+30 }
 0x474   :  { %v3419_v57 = vpop.xlane.xlu1 %1314 }
 0x478   :  { %v1927_v42 = vpop.permute.xlu1 %1926 }
 0x479   :  { %2010 = vst.msk [vmem:[%s3953_s8 + $0x68] sm:$0xff] %vm1996_vm2, %v1927_v42  ;;  %v3519_v42 = vadd.f32 %v3243_v24, %v3142_v34 }
 0x47b   :  { %v3525_v14 = vsel %vm1257_vm1, %v3519_v42, -1e+30 }
 0x47d   :  { %1328 = vmax.xlane.f32.xlu0 %v3427_v28 }
 0x486   :  { %1326 = vmax.xlane.f32.xlu1 %v3432_v36 }
 0x493   :  { %1940 = vrot.lane.b32.xlu0 %v1209_v44, %s2650_s5  ;;  %v1220_v44 = vadd.f32 %v3213_v38, %v3142_v34 }
 0x497   :  { %1938 = vrot.lane.b32.xlu1 %v1204_v33, %s2650_s5 }
 0x4a0   :  { %v3441_v59 = vpop.xlane.xlu0 %1320 }
 0x4a4   :  { %v1933_v63 = vpop.permute.xlu0 %1932 }
 0x4a5   :  { %2013 = vst.msk [vmem:[%s3953_s8 + $0x80] sm:$0xff] %vm1996_vm2, %v1933_v63 }
 0x4a9   :  { %v3447_v7 = vpop.xlane.xlu1 %1318 }
 0x4ad   :  { %v1931_v12 = vpop.permute.xlu1 %1930 }
 0x4ae   :  { %2012 = vst.msk [vmem:[%s3953_s8 + $0x78] sm:$0xff] %vm1996_vm2, %v1931_v12  ;;  %v1356_v12 = vsub.f32 %v3164_v60, %v3271_v37  ;;  %v1362_v60 = vsub.f32 %v3257_v31, %v3329_v61  ;;  %v3552_v37 = vsel %vm1257_vm1, %v1220_v44, -1e+30  ;;  %v3565_v31 = vadd.f32 %v3227_v1, %v3142_v34 }
 0x4af   :  { %v1366_v61 = vsub.f32 %v3315_v32, %v3385_v26  ;;  %v3582_v1 = vadd.f32 %v3234_v18, %v3142_v34  ;;  %v1368_v26 = vsub.f32 %v3343_v2, %v3413_v58 }
 0x4b0   :  { %v1388_v38 = vmul.f32 1.442695, %v1356_v12 }
 0x4b1   :  { %v1408_v32 = vmul.f32 1.442695, %v1366_v61  ;;  %v1412_v18 = vmul.f32 1.442695, %v1368_v26 }
 0x4b2   :  { %1332 = vmax.xlane.f32.xlu0 %v3455_v43  ;;  %2470 = vpow2.f32 %v1388_v38  ;;  %v3595_v38 = vsel %vm1257_vm1, %v3582_v1, -1e+30 }
 0x4bb   :  { %1330 = vmax.xlane.f32.xlu1 %v3460_v46 }
 0x4c8   :  { %1944 = vrot.lane.b32.xlu0 %v1217_v16, %s2650_s5 }
 0x4cc   :  { %1942 = vrot.lane.b32.xlu1 %v1212_v19, %s2650_s5  ;;  %v1358_v19 = vsub.f32 %v3180_v5, %v3279_v52  ;;  %v1400_v5 = vmul.f32 1.442695, %v1362_v60  ;;  %v1364_v52 = vsub.f32 %v3287_v10, %v3357_v17  ;;  %v3578_v17 = vsel %vm1257_vm1, %v3565_v31, -1e+30 }
 0x4d5   :  { %v3469_v22 = vpop.xlane.xlu0 %1324 }
 0x4d9   :  { %v1937_v8 = vpop.permute.xlu0 %1936 }
 0x4da   :  { %2015 = vst.msk [vmem:[%s3953_s8 + $0x90] sm:$0xff] %vm1996_vm2, %v1937_v8  ;;  %v1392_v8 = vmul.f32 1.442695, %v1358_v19  ;;  %v1370_v19 = vsub.f32 %v3371_v15, %v3441_v59 }
 0x4dc   :  { %2472 = vpow2.f32 %v1392_v8  ;;  %v1416_v8 = vmul.f32 1.442695, %v1370_v19 }
 0x4de   :  { %v3475_v23 = vpop.xlane.xlu1 %1322 }
 0x4e2   :  { %v1935_v6 = vpop.permute.xlu1 %1934 }
 0x4e3   :  { %2014 = vst.msk [vmem:[%s3953_s8 + $0x88] sm:$0xff] %vm1996_vm2, %v1935_v6  ;;  %v1360_v6 = vsub.f32 %v3211_v56, %v3301_v39  ;;  %v2471_v56 = vpop.eup %2470 }
 0x4e6   :  { %v2473_v10 = vpop.eup %2472 }
 0x4e7   :  { %1336 = vmax.xlane.f32.xlu0 %v3483_v51  ;;  %v3589_v12 = vsel %vm1257_vm1, %v2473_v10, 0.0 }
 0x4eb   :  { %1340 = vmax.xlane.f32.xlu0 %v3490_v41 }
 0x4ef   :  { %1344 = vmax.xlane.f32.xlu0 %v3500_v49 }
 0x4f0   :  { %1334 = vmax.xlane.f32.xlu1 %v3509_v55 }
 0x4f3   :  { %1348 = vmax.xlane.f32.xlu0 %v3515_v35 }
 0x4f7   :  { %1352 = vmax.xlane.f32.xlu0 %v3525_v14 }
 0x501   :  { %1946 = vrot.lane.b32.xlu1 %v1220_v44, %s2650_s5  ;;  %v3572_v44 = vsel %vm1257_vm1, %v2471_v56, 0.0 }
 0x50a   :  { %v1329_v33 = vpop.xlane.xlu0 %1328 }
 0x50b   :  { %v1374_v59 = vsub.f32 %v3427_v28, %v1329_v33 }
 0x50d   :  { %1948 = vrot.lane.b32.xlu0 %v1225_v54, %s2650_s5  ;;  %v1396_v54 = vmul.f32 1.442695, %v1360_v6  ;;  %v1372_v6 = vsub.f32 %v3399_v21, %v3469_v22  ;;  %v1424_v21 = vmul.f32 1.442695, %v1374_v59  ;;  %v1359_v59 = vsub.f32 %v3222_v50, %v3307_v40 }
 0x50e   :  { %v1941_v63 = vpop.permute.xlu0 %1940 }
 0x50f   :  { %2017 = vst.msk [vmem:[%s3953_s8 + $0xa0] sm:$0xff] %vm1996_vm2, %v1941_v63  ;;  %v1228_v63 = vadd.f32 %v3218_v47, %v3142_v34  ;;  %2474 = vpow2.f32 %v1396_v54  ;;  %v1404_v47 = vmul.f32 1.442695, %v1364_v52  ;;  %v1420_v15 = vmul.f32 1.442695, %v1372_v6 }
 0x510   :  { %2476 = vpow2.f32 %v1400_v5 }
 0x511   :  { %v3561_v39 = vsel %vm1257_vm1, %v1228_v63, -1e+30  ;;  %2478 = vpow2.f32 %v1404_v47 }
 0x512   :  { %2480 = vpow2.f32 %v1408_v32 }
 0x513   :  { %v3536_v24 = vpop.xlane.xlu1 %1326  ;;  %2482 = vpow2.f32 %v1412_v18 }
 0x514   :  { %2484 = vpow2.f32 %v1416_v8 }
 0x515   :  { %2486 = vpow2.f32 %v1420_v15 }
 0x516   :  { %2488 = vpow2.f32 %v1424_v21  ;;  %v1361_v21 = vsub.f32 %v3262_v9, %v3335_v3  ;;  %v1369_v3 = vsub.f32 %v3376_v0, %v3447_v7  ;;  %v1373_v7 = vsub.f32 %v3432_v36, %v3536_v24 }
 0x517   :  { %v1939_v16 = vpop.permute.xlu1 %1938 }
 0x518   :  { %2016 = vst.msk [vmem:[%s3953_s8 + $0x98] sm:$0xff] %vm1996_vm2, %v1939_v16 }
 0x519   :  { %v2475_v16 = vpop.eup %2474 }
 0x51a   :  { %v3602_v2 = vsel %vm1257_vm1, %v2475_v16, 0.0  ;;  %v2477_v58 = vpop.eup %2476 }
 0x51b   :  { %v3609_v54 = vsel %vm1257_vm1, %v2477_v58, 0.0  ;;  %v2479_v60 = vpop.eup %2478 }
 0x51c   :  { %v3615_v5 = vsel %vm1257_vm1, %v2479_v60, 0.0  ;;  %v2481_v52 = vpop.eup %2480  ;;  %v1357_v60 = vsub.f32 %v3171_v29, %v3273_v48  ;;  %v1365_v48 = vsub.f32 %v3320_v62, %v3391_v30 }
 0x51d   :  { %v3620_v56 = vsel %vm1257_vm1, %v2481_v52, 0.0  ;;  %v2483_v47 = vpop.eup %2482  ;;  %v1394_v52 = vmul.f32 1.442695, %v1359_v59 }
 0x51e   :  { %v3627_v10 = vsel %vm1257_vm1, %v2483_v47, 0.0  ;;  %v2485_v32 = vpop.eup %2484  ;;  %v1390_v15 = vmul.f32 1.442695, %v1357_v60  ;;  %v1363_v47 = vsub.f32 %v3292_v53, %v3363_v20  ;;  %v1406_v40 = vmul.f32 1.442695, %v1365_v48 }
 0x51f   :  { %v2487_v26 = vpop.eup %2486  ;;  %v1367_v53 = vsub.f32 %v3348_v11, %v3419_v57  ;;  %v1414_v11 = vmul.f32 1.442695, %v1369_v3  ;;  %v1371_v57 = vsub.f32 %v3404_v25, %v3475_v23 }
 0x520   :  { %v3643_v16 = vsel %vm1257_vm1, %v2487_v26, 0.0  ;;  %v2489_v18 = vpop.eup %2488  ;;  %v1402_v29 = vmul.f32 1.442695, %v1363_v47 }
 0x521   :  { %v3652_v58 = vsel %vm1257_vm1, %v2489_v18, 0.0  ;;  %v1410_v62 = vmul.f32 1.442695, %v1367_v53  ;;  %v1418_v0 = vmul.f32 1.442695, %v1371_v57 }
 0x525   :  { %1338 = vmax.xlane.f32.xlu1 %v3552_v37 }
 0x529   :  { %1342 = vmax.xlane.f32.xlu1 %v3561_v39 }
 0x52c   :  { %1484 = vadd.xlane.f32.xlu0 %v3572_v44 }
 0x52d   :  { %1346 = vmax.xlane.f32.xlu1 %v3578_v17 }
 0x530   :  { %1488 = vadd.xlane.f32.xlu0 %v3589_v12 }
 0x531   :  { %1350 = vmax.xlane.f32.xlu1 %v3595_v38 }
 0x534   :  { %1492 = vadd.xlane.f32.xlu0 %v3602_v2 }
 0x538   :  { %1496 = vadd.xlane.f32.xlu0 %v3609_v54 }
 0x53c   :  { %1500 = vadd.xlane.f32.xlu0 %v3615_v5 }
 0x53f   :  { %v1333_v22 = vpop.xlane.xlu0 %1332 }
 0x540   :  { %v1376_v61 = vsub.f32 %v3455_v43, %v1333_v22  ;;  %1504 = vadd.xlane.f32.xlu0 %v3620_v56  ;;  %v3636_v43 = vsel %vm1257_vm1, %v2485_v32, 0.0  ;;  %v1398_v22 = vmul.f32 1.442695, %v1361_v21 }
 0x542   :  { %v1428_v28 = vmul.f32 1.442695, %v1376_v61  ;;  %1950 = vrot.lane.b32.xlu1 %v1228_v63, %s2650_s5  ;;  %v3670_v61 = vadd.f32 %v3249_v27, %v3142_v34 }
 0x543   :  { %v1945_v33 = vpop.permute.xlu0 %1944 }
 0x544   :  { %2019 = vst.msk [vmem:[%s3953_s8 + $0xb0] sm:$0xff] %vm1996_vm2, %v1945_v33  ;;  %1508 = vadd.xlane.f32.xlu0 %v3627_v10  ;;  %2490 = vpow2.f32 %v1428_v28  ;;  %v3677_v50 = vsel %vm1257_vm1, %v3670_v61, -1e+30 }
 0x545   :  { %2492 = vpow2.f32 %v1390_v15 }
 0x546   :  { %2494 = vpow2.f32 %v1394_v52 }
 0x547   :  { %2496 = vpow2.f32 %v1398_v22 }
 0x548   :  { %v3638_v63 = vpop.xlane.xlu1 %1330  ;;  %1512 = vadd.xlane.f32.xlu0 %v3636_v43  ;;  %2498 = vpow2.f32 %v1402_v29 }
 0x549   :  { %2500 = vpow2.f32 %v1406_v40 }
 0x54a   :  { %2502 = vpow2.f32 %v1410_v62 }
 0x54b   :  { %2504 = vpow2.f32 %v1414_v11 }
 0x54c   :  { %v1943_v19 = vpop.permute.xlu1 %1942  ;;  %1516 = vadd.xlane.f32.xlu0 %v3643_v16  ;;  %2506 = vpow2.f32 %v1418_v0 }
 0x54d   :  { %2018 = vst.msk [vmem:[%s3953_s8 + $0xa8] sm:$0xff] %vm1996_vm2, %v1943_v19  ;;  %v1422_v19 = vmul.f32 1.442695, %v1373_v7 }
 0x54e   :  { %v2491_v8 = vpop.eup %2490 }
 0x54f   :  { %v3657_v6 = vsel %vm1257_vm1, %v2491_v8, 0.0  ;;  %v2493_v9 = vpop.eup %2492  ;;  %v1375_v8 = vsub.f32 %v3460_v46, %v3638_v63 }
 0x550   :  { %1520 = vadd.xlane.f32.xlu0 %v3652_v58  ;;  %v3684_v34 = vsel %vm1257_vm1, %v2493_v9, 0.0  ;;  %v2495_v27 = vpop.eup %2494 }
 0x551   :  { %v3691_v20 = vsel %vm1257_vm1, %v2495_v27, 0.0  ;;  %v2497_v30 = vpop.eup %2496  ;;  %v1426_v59 = vmul.f32 1.442695, %v1375_v8 }
 0x552   :  { %v3698_v28 = vsel %vm1257_vm1, %v2497_v30, 0.0  ;;  %v2499_v33 = vpop.eup %2498 }
 0x553   :  { %v3706_v18 = vsel %vm1257_vm1, %v2499_v33, 0.0  ;;  %v2501_v25 = vpop.eup %2500 }
 0x554   :  { %1524 = vadd.xlane.f32.xlu0 %v3657_v6  ;;  %v2503_v24 = vpop.eup %2502 }
 0x555   :  { %v3720_v46 = vsel %vm1257_vm1, %v2503_v24, 0.0 }
 0x566   :  { %1354 = vmax.xlane.f32.xlu1 %v3677_v50 }
 0x56a   :  { %1486 = vadd.xlane.f32.xlu1 %v3684_v34 }
 0x56e   :  { %1490 = vadd.xlane.f32.xlu1 %v3691_v20 }
 0x572   :  { %1494 = vadd.xlane.f32.xlu1 %v3698_v28 }
 0x574   :  { %v1337_v32 = vpop.xlane.xlu0 %1336 }
 0x575   :  { %v1378_v26 = vsub.f32 %v3483_v51, %v1337_v32  ;;  %v3714_v51 = vsel %vm1257_vm1, %v2501_v25, 0.0 }
 0x576   :  { %1498 = vadd.xlane.f32.xlu1 %v3706_v18 }
 0x577   :  { %v1432_v23 = vmul.f32 1.442695, %v1378_v26 }
 0x578   :  { %v1341_v60 = vpop.xlane.xlu0 %1340 }
 0x579   :  { %2508 = vpow2.f32 %v1432_v23  ;;  %v1380_v36 = vsub.f32 %v3490_v41, %v1341_v60  ;;  %v2505_v41 = vpop.eup %2504 }
 0x57a   :  { %1502 = vadd.xlane.f32.xlu1 %v3714_v51  ;;  %2510 = vpow2.f32 %v1422_v19  ;;  %v2507_v53 = vpop.eup %2506 }
 0x57b   :  { %v1436_v15 = vmul.f32 1.442695, %v1380_v36  ;;  %v3742_v30 = vsel %vm1257_vm1, %v2507_v53, 0.0 }
 0x57c   :  { %v1345_v52 = vpop.xlane.xlu0 %1344 }
 0x57d   :  { %2512 = vpow2.f32 %v1436_v15  ;;  %v1382_v21 = vsub.f32 %v3500_v49, %v1345_v52  ;;  %v1335_v22 = vpop.xlane.xlu1 %1334  ;;  %v3727_v49 = vsel %vm1257_vm1, %v2505_v41, 0.0 }
 0x57e   :  { %v1377_v63 = vsub.f32 %v3509_v55, %v1335_v22  ;;  %1506 = vadd.xlane.f32.xlu1 %v3720_v46  ;;  %2514 = vpow2.f32 %v1426_v59 }
 0x57f   :  { %v1440_v47 = vmul.f32 1.442695, %v1382_v21 }
 0x580   :  { %v1430_v29 = vmul.f32 1.442695, %v1377_v63  ;;  %v1349_v48 = vpop.xlane.xlu0 %1348 }
 0x581   :  { %2516 = vpow2.f32 %v1440_v47  ;;  %v1384_v9 = vsub.f32 %v3515_v35, %v1349_v48  ;;  %v1947_v40 = vpop.permute.xlu1 %1946 }
 0x582   :  { %2020 = vst.msk [vmem:[%s3953_s8 + $0xb8] sm:$0xff] %vm1996_vm2, %v1947_v40  ;;  %1510 = vadd.xlane.f32.xlu1 %v3727_v49  ;;  %2518 = vpow2.f32 %v1430_v29 }
 0x583   :  { %v2509_v55 = vpop.eup %2508  ;;  %v1444_v27 = vmul.f32 1.442695, %v1384_v9 }
 0x584   :  { %v1353_v62 = vpop.xlane.xlu0 %1352  ;;  %v3736_v35 = vsel %vm1257_vm1, %v2509_v55, 0.0  ;;  %v2511_v11 = vpop.eup %2510 }
 0x585   :  { %2520 = vpow2.f32 %v1444_v27  ;;  %v1386_v3 = vsub.f32 %v3525_v14, %v1353_v62  ;;  %1528 = vadd.xlane.f32.xlu0 %v3736_v35  ;;  %v3756_v14 = vsel %vm1257_vm1, %v2511_v11, 0.0 }
 0x586   :  { %1514 = vadd.xlane.f32.xlu1 %v3742_v30 }
 0x587   :  { %v2513_v57 = vpop.eup %2512  ;;  %v1448_v33 = vmul.f32 1.442695, %v1386_v3 }
 0x588   :  { %v1949_v0 = vpop.permute.xlu0 %1948  ;;  %v3747_v7 = vsel %vm1257_vm1, %v2513_v57, 0.0  ;;  %v2515_v32 = vpop.eup %2514 }
 0x589   :  { %2522 = vpow2.f32 %v1448_v33  ;;  %2021 = vst.msk [vmem:[%s3953_s8 + $0xc0] sm:$0xff] %vm1996_vm2, %v1949_v0  ;;  %1532 = vadd.xlane.f32.xlu0 %v3747_v7  ;;  %v3766_v23 = vsel %vm1257_vm1, %v2515_v32, 0.0 }
 0x58a   :  { %1518 = vadd.xlane.f32.xlu1 %v3756_v14 }
 0x58b   :  { %v2517_v26 = vpop.eup %2516 }
 0x58c   :  { %v3761_v25 = vsel %vm1257_vm1, %v2517_v26, 0.0  ;;  %v2519_v19 = vpop.eup %2518 }
 0x58d   :  { %1536 = vadd.xlane.f32.xlu0 %v3761_v25  ;;  %v3776_v36 = vsel %vm1257_vm1, %v2519_v19, 0.0 }
 0x58e   :  { %1522 = vadd.xlane.f32.xlu1 %v3766_v23 }
 0x58f   :  { %v2521_v8 = vpop.eup %2520 }
 0x590   :  { %v3771_v60 = vsel %vm1257_vm1, %v2521_v8, 0.0 }
 0x591   :  { %1540 = vadd.xlane.f32.xlu0 %v3771_v60 }
 0x592   :  { %1526 = vadd.xlane.f32.xlu1 %v3776_v36 }
 0x593   :  { %v2523_v24 = vpop.eup %2522 }
 0x594   :  { %v3781_v15 = vsel %vm1257_vm1, %v2523_v24, 0.0 }
 0x595   :  { %3957 = vst [vmem:[#allocation8_spill] sm:$0xff] %v3781_v15  ;;  %1544 = vadd.xlane.f32.xlu0 %v3781_v15 }
 0x5ab   :  { %1952 = vrot.lane.b32.xlu0 %v3494_v45, %s2650_s5 }
 0x5af   :  { %1956 = vrot.lane.b32.xlu0 %v3504_v4, %s2650_s5 }
 0x5b2   :  { %v1339_v59 = vpop.xlane.xlu1 %1338 }
 0x5b3   :  { %v1379_v52 = vsub.f32 %v3552_v37, %v1339_v59  ;;  %1960 = vrot.lane.b32.xlu0 %v3519_v42, %s2650_s5 }
 0x5b5   :  { %v1434_v21 = vmul.f32 1.442695, %v1379_v52 }
 0x5b6   :  { %v1343_v22 = vpop.xlane.xlu1 %1342 }
 0x5b7   :  { %2524 = vpow2.f32 %v1434_v21  ;;  %v1381_v41 = vsub.f32 %v3561_v39, %v1343_v22 }
 0x5b9   :  { %v1438_v63 = vmul.f32 1.442695, %v1381_v41  ;;  %v1485_v62 = vpop.xlane.xlu0 %1484 }
 0x5ba   :  { %v1347_v47 = vpop.xlane.xlu1 %1346 }
 0x5bb   :  { %2526 = vpow2.f32 %v1438_v63  ;;  %v1383_v29 = vsub.f32 %v3578_v17, %v1347_v47 }
 0x5bd   :  { %v1442_v45 = vmul.f32 1.442695, %v1383_v29  ;;  %v1489_v3 = vpop.xlane.xlu0 %1488 }
 0x5be   :  { %v1351_v48 = vpop.xlane.xlu1 %1350 }
 0x5bf   :  { %2528 = vpow2.f32 %v1442_v45  ;;  %v1385_v4 = vsub.f32 %v3595_v38, %v1351_v48 }
 0x5c1   :  { %v2525_v9 = vpop.eup %2524  ;;  %v1446_v37 = vmul.f32 1.442695, %v1385_v4  ;;  %v1493_v11 = vpop.xlane.xlu0 %1492 }
 0x5c2   :  { %v1951_v40 = vpop.permute.xlu1 %1950  ;;  %v3796_v42 = vsel %vm1257_vm1, %v2525_v9, 0.0 }
 0x5c3   :  { %2530 = vpow2.f32 %v1446_v37  ;;  %2022 = vst.msk [vmem:[%s3953_s8 + $0xc8] sm:$0xff] %vm1996_vm2, %v1951_v40  ;;  %1530 = vadd.xlane.f32.xlu1 %v3796_v42 }
 0x5c4   :  { %2532 = vrcp.f32 %v1485_v62 }
 0x5c5   :  { %v2527_v39 = vpop.eup %2526  ;;  %v1497_v57 = vpop.xlane.xlu0 %1496  ;;  %2534 = vrcp.f32 %v1489_v3 }
 0x5c6   :  { %v3805_v17 = vsel %vm1257_vm1, %v2527_v39, 0.0  ;;  %2536 = vrcp.f32 %v1493_v11 }
 0x5c7   :  { %1534 = vadd.xlane.f32.xlu1 %v3805_v17 }
 0x5c9   :  { %v2529_v38 = vpop.eup %2528  ;;  %v1501_v33 = vpop.xlane.xlu0 %1500 }
 0x5ca   :  { %v3810_v53 = vsel %vm1257_vm1, %v2529_v38, 0.0 }
 0x5cb   :  { %1538 = vadd.xlane.f32.xlu1 %v3810_v53 }
 0x5cd   :  { %v2531_v55 = vpop.eup %2530  ;;  %v3822_v0 = vpop.xlane.xlu0 %1504 }
 0x5ce   :  { %v3815_v27 = vsel %vm1257_vm1, %v2531_v55, 0.0 }
 0x5cf   :  { %3958 = vst [vmem:[#allocation9_spill] sm:$0xff] %v3815_v27  ;;  %1542 = vadd.xlane.f32.xlu1 %v3815_v27 }
 0x5d1   :  { %v3825_v19 = vpop.xlane.xlu0 %1508 }
 0x5d5   :  { %v3827_v52 = vpop.xlane.xlu0 %1512 }
 0x5d9   :  { %v3829_v47 = vpop.xlane.xlu0 %1516 }
 0x5e0   :  { %1954 = vrot.lane.b32.xlu1 %v3565_v31, %s2650_s5  ;;  %v2533_v31 = vpop.eup %2532 }
 0x5e1   :  { %v1580_v21 = vmul.f32 %v2533_v31, %v1485_v62 }
 0x5e3   :  { %v1612_v63 = vsub.f32 2.0, %v1580_v21 }
 0x5e4   :  { %1958 = vrot.lane.b32.xlu1 %v3582_v1, %s2650_s5  ;;  %v2535_v1 = vpop.eup %2534 }
 0x5e5   :  { %v1582_v41 = vmul.f32 %v2535_v1, %v1489_v3  ;;  %v1644_v38 = vmul.f32 %v2533_v31, %v1612_v63 }
 0x5e7   :  { %v1614_v37 = vsub.f32 2.0, %v1582_v41 }
 0x5f3   :  { %v1355_v32 = vpop.xlane.xlu1 %1354 }
 0x5f4   :  { %v1387_v26 = vsub.f32 %v3677_v50, %v1355_v32  ;;  %v2537_v50 = vpop.eup %2536 }
 0x5f5   :  { %v1584_v40 = vmul.f32 %v2537_v50, %v1493_v11  ;;  %v1646_v11 = vmul.f32 %v2535_v1, %v1614_v37 }
 0x5f6   :  { %v1450_v8 = vmul.f32 1.442695, %v1387_v26 }
 0x5f7   :  { %v1487_v24 = vpop.xlane.xlu1 %1486  ;;  %v1616_v41 = vsub.f32 2.0, %v1584_v40 }
 0x5f8   :  { %2538 = vrcp.f32 %v1487_v24 }
 0x5f9   :  { %2540 = vpow2.f32 %v1450_v8  ;;  %v3837_v8 = vpop.xlane.xlu0 %1520  ;;  %v1648_v1 = vmul.f32 %v2537_v50, %v1616_v41 }
 0x5fa   :  { %2542 = vrcp.f32 %v1497_v57 }
 0x5fb   :  { %v1491_v59 = vpop.xlane.xlu1 %1490 }
 0x5fc   :  { %2544 = vrcp.f32 %v1491_v59 }
 0x5fd   :  { %2546 = vrcp.f32 %v1501_v33 }
 0x5ff   :  { %v1495_v22 = vpop.xlane.xlu1 %1494 }
 0x600   :  { %2548 = vrcp.f32 %v1495_v22 }
 0x601   :  { %2550 = vrcp.f32 %v3822_v0 }
 0x602   :  { %v2539_v29 = vpop.eup %2538 }
 0x603   :  { %v1499_v45 = vpop.xlane.xlu1 %1498  ;;  %v2541_v48 = vpop.eup %2540  ;;  %v1581_v4 = vmul.f32 %v2539_v29, %v1487_v24 }
 0x604   :  { %2552 = vrcp.f32 %v1499_v45  ;;  %v2543_v9 = vpop.eup %2542  ;;  %v3835_v32 = vsel %vm1257_vm1, %v2541_v48, 0.0 }
 0x605   :  { %v1613_v55 = vsub.f32 2.0, %v1581_v4  ;;  %2554 = vrcp.f32 %v3825_v19  ;;  %3959 = vst [vmem:[#allocation10_spill] sm:$0xff] %v3835_v32  ;;  %v1586_v26 = vmul.f32 %v2543_v9, %v1497_v57  ;;  %v1676_v4 = vmul.f32 %v1644_v38, %v3572_v44  ;;  %v3845_v44 = vpop.xlane.xlu0 %1524 }
 0x606   :  { %v2545_v39 = vpop.eup %2544 }
 0x607   :  { %v1583_v62 = vmul.f32 %v2545_v39, %v1491_v59  ;;  %v1503_v3 = vpop.xlane.xlu1 %1502  ;;  %v1645_v21 = vmul.f32 %v2539_v29, %v1613_v55  ;;  %v2547_v24 = vpop.eup %2546  ;;  %v1618_v15 = vsub.f32 2.0, %v1586_v26 }
 0x608   :  { %2556 = vrcp.f32 %v1503_v3  ;;  %1546 = vadd.xlane.f32.xlu1 %v3835_v32  ;;  %v1588_v27 = vmul.f32 %v2547_v24, %v1501_v33  ;;  %v1678_v32 = vmul.f32 %v1646_v11, %v3589_v12  ;;  %v1680_v12 = vmul.f32 %v1648_v1, %v3602_v2 }
 0x609   :  { %v1615_v31 = vsub.f32 2.0, %v1583_v62  ;;  %v1677_v59 = vmul.f32 %v1645_v21, %v3684_v34  ;;  %2558 = vrcp.f32 %v3827_v52  ;;  %v1650_v33 = vmul.f32 %v2543_v9, %v1618_v15 }
 0x60a   :  { %v2549_v63 = vpop.eup %2548  ;;  %v1620_v26 = vsub.f32 2.0, %v1588_v27 }
 0x60b   :  { %v1647_v13 = vmul.f32 %v2545_v39, %v1615_v31  ;;  %v1585_v48 = vmul.f32 %v2549_v63, %v1495_v22  ;;  %v1507_v57 = vpop.xlane.xlu1 %1506  ;;  %v2186_v29 = vpack.c.bf16 %v1677_v59, %v1676_v4  ;;  %v2551_v55 = vpop.eup %2550  ;;  %v1682_v27 = vmul.f32 %v1650_v33, %v3609_v54 }
 0x60c   :  { %2560 = vrcp.f32 %v1507_v57  ;;  %v1590_v50 = vmul.f32 %v2551_v55, %v3822_v0  ;;  %v1652_v9 = vmul.f32 %v2547_v24, %v1620_v26 }
 0x60d   :  { %v1679_v37 = vmul.f32 %v1647_v13, %v3691_v20  ;;  %v1617_v40 = vsub.f32 2.0, %v1585_v48  ;;  %2187 = vst [vmem:[#allocation5] sm:$0xff] %v2186_v29   ;;  %2562 = vrcp.f32 %v3829_v47 }
 0x60e   :  { %v2553_v62 = vpop.eup %2552  ;;  %v1622_v4 = vsub.f32 2.0, %v1590_v50  ;;  %v1684_v54 = vmul.f32 %v1652_v9, %v3615_v5 }
 0x60f   :  { %v2191_v34 = vpack.c.bf16 %v1679_v37, %v1678_v32  ;;  %v1649_v22 = vmul.f32 %v2549_v63, %v1617_v40  ;;  %v1587_v39 = vmul.f32 %v2553_v62, %v1499_v45  ;;  %v1511_v38 = vpop.xlane.xlu1 %1510  ;;  %v2555_v21 = vpop.eup %2554 }
 0x610   :  { %2564 = vrcp.f32 %v1511_v38  ;;  %v1592_v0 = vmul.f32 %v2555_v21, %v3825_v19  ;;  %v1654_v19 = vmul.f32 %v2551_v55, %v1622_v4 }
 0x611   :  { %2263 = vst [vmem:[#allocation5 + $0x8] sm:$0xff] %v2191_v34   ;;  %v1681_v20 = vmul.f32 %v1649_v22, %v3698_v28  ;;  %v1619_v11 = vsub.f32 2.0, %v1587_v39  ;;  %2566 = vrcp.f32 %v3837_v8 }
 0x612   :  { %v2557_v41 = vpop.eup %2556  ;;  %v3851_v31 = vpop.xlane.xlu0 %1528  ;;  %v1686_v50 = vmul.f32 %v1654_v19, %v3620_v56 }
 0x613   :  { %v2196_v32 = vpack.c.bf16 %v1681_v20, %v1680_v12  ;;  %v1651_v45 = vmul.f32 %v2553_v62, %v1619_v11  ;;  %v1589_v63 = vmul.f32 %v2557_v41, %v1503_v3  ;;  %v1515_v15 = vpop.xlane.xlu1 %1514  ;;  %v2559_v2 = vpop.eup %2558  ;;  %v1624_v62 = vsub.f32 2.0, %v1592_v0 }
 0x614   :  { %2568 = vrcp.f32 %v1515_v15  ;;  %v1594_v24 = vmul.f32 %v2559_v2, %v3827_v52 }
 0x615   :  { %2264 = vst [vmem:[#allocation5 + $0x10] sm:$0xff] %v2196_v32   ;;  %v1683_v28 = vmul.f32 %v1651_v45, %v3706_v18  ;;  %v1621_v59 = vsub.f32 2.0, %v1589_v63  ;;  %2570 = vrcp.f32 %v3845_v44  ;;  %v1656_v20 = vmul.f32 %v2555_v21, %v1624_v62 }
 0x616   :  { %v2561_v13 = vpop.eup %2560  ;;  %v3857_v48 = vpop.xlane.xlu0 %1532  ;;  %v1626_v12 = vsub.f32 2.0, %v1594_v24 }
 0x617   :  { %v2201_v29 = vpack.c.bf16 %v1683_v28, %v1682_v27  ;;  %v1653_v3 = vmul.f32 %v2557_v41, %v1621_v59  ;;  %v1591_v1 = vmul.f32 %v2561_v13, %v1507_v57  ;;  %v1519_v37 = vpop.xlane.xlu1 %1518  ;;  %v2563_v40 = vpop.eup %2562  ;;  %v1688_v4 = vmul.f32 %v1656_v20, %v3627_v10 }
 0x618   :  { %2572 = vrcp.f32 %v1519_v37  ;;  %v1596_v52 = vmul.f32 %v2563_v40, %v3829_v47  ;;  %v1658_v27 = vmul.f32 %v2559_v2, %v1626_v12 }
 0x619   :  { %2265 = vst [vmem:[#allocation5 + $0x18] sm:$0xff] %v2201_v29   ;;  %v1685_v18 = vmul.f32 %v1653_v3, %v3714_v51  ;;  %v1623_v34 = vsub.f32 2.0, %v1591_v1  ;;  %1962 = vrot.lane.b32.xlu1 %v3670_v61, %s2650_s5 }
 0x61a   :  { %v2565_v22 = vpop.eup %2564  ;;  %v3865_v39 = vpop.xlane.xlu0 %1536  ;;  %v1628_v9 = vsub.f32 2.0, %v1596_v52 }
 0x61b   :  { %v2206_v57 = vpack.c.bf16 %v1685_v18, %v1684_v54  ;;  %v1655_v33 = vmul.f32 %v2561_v13, %v1623_v34  ;;  %v1593_v26 = vmul.f32 %v2565_v22, %v1511_v38  ;;  %v1523_v5 = vpop.xlane.xlu1 %1522  ;;  %v2567_v55 = vpop.eup %2566 }
 0x61c   :  { %2574 = vrcp.f32 %v1523_v5  ;;  %v1598_v56 = vmul.f32 %v2567_v55, %v3837_v8  ;;  %v1660_v2 = vmul.f32 %v2563_v40, %v1628_v9 }
 0x61d   :  { %2266 = vst [vmem:[#allocation5 + $0x20] sm:$0xff] %v2206_v57   ;;  %v1687_v51 = vmul.f32 %v1655_v33, %v3720_v46  ;;  %v1625_v11 = vsub.f32 2.0, %v1593_v26 }
 0x61e   :  { %v2569_v61 = vpop.eup %2568  ;;  %v3870_v41 = vpop.xlane.xlu0 %1540  ;;  %v1630_v3 = vsub.f32 2.0, %v1598_v56 }
 0x61f   :  { %v2211_v32 = vpack.c.bf16 %v1687_v51, %v1686_v50  ;;  %v1657_v45 = vmul.f32 %v2565_v22, %v1625_v11  ;;  %v1595_v63 = vmul.f32 %v2569_v61, %v1515_v15  ;;  %v1527_v38 = vpop.xlane.xlu1 %1526  ;;  %v2571_v47 = vpop.eup %2570  ;;  %v1690_v15 = vmul.f32 %v1658_v27, %v3636_v43 }
 0x620   :  { %2576 = vrcp.f32 %v1527_v38  ;;  %v1600_v1 = vmul.f32 %v2571_v47, %v3845_v44  ;;  %v1692_v43 = vmul.f32 %v1660_v2, %v3643_v16 }
 0x621   :  { %2267 = vst [vmem:[#allocation5 + $0x28] sm:$0xff] %v2211_v32   ;;  %v1689_v21 = vmul.f32 %v1657_v45, %v3727_v49  ;;  %v1627_v46 = vsub.f32 2.0, %v1595_v63  ;;  %2578 = vrcp.f32 %v3851_v31 }
 0x622   :  { %v2573_v0 = vpop.eup %2572  ;;  %v3875_v28 = vpop.xlane.xlu0 %1544  ;;  %v1632_v40 = vsub.f32 2.0, %v1600_v1  ;;  %2580 = vrcp.f32 %v3857_v48 }
 0x623   :  { %v2216_v59 = vpack.c.bf16 %v1689_v21, %v1688_v4  ;;  %v1659_v13 = vmul.f32 %v2569_v61, %v1627_v46  ;;  %v1597_v29 = vmul.f32 %v2573_v0, %v1519_v37  ;;  %v1662_v37 = vmul.f32 %v2567_v55, %v1630_v3 }
 0x624   :  { %2582 = vrcp.f32 %v3865_v39 }
 0x625   :  { %2268 = vst [vmem:[#allocation5 + $0x30] sm:$0xff] %v2216_v59   ;;  %v1691_v10 = vmul.f32 %v1659_v13, %v3742_v30  ;;  %v1629_v8 = vsub.f32 2.0, %v1597_v29  ;;  %v1694_v26 = vmul.f32 %v1662_v37, %v3652_v58 }
 0x626   :  { %v2575_v54 = vpop.eup %2574  ;;  %v1953_v24 = vpop.permute.xlu0 %1952 }
 0x627   :  { %v2221_v49 = vpack.c.bf16 %v1691_v10, %v1690_v15  ;;  %v1661_v19 = vmul.f32 %v2573_v0, %v1629_v8  ;;  %v1599_v62 = vmul.f32 %v2575_v54, %v1523_v5  ;;  %2023 = vst.msk [vmem:[%s3953_s8 + $0xd0] sm:$0xff] %vm1996_vm2, %v1953_v24  ;;  %v1664_v5 = vmul.f32 %v2571_v47, %v1632_v40 }
 0x629   :  { %2269 = vst [vmem:[#allocation5 + $0x38] sm:$0xff] %v2221_v49   ;;  %v1693_v44 = vmul.f32 %v1661_v19, %v3756_v14  ;;  %v1631_v18 = vsub.f32 2.0, %v1599_v62  ;;  %v1696_v50 = vmul.f32 %v1664_v5, %v3657_v6 }
 0x62a   :  { %v2577_v30 = vpop.eup %2576  ;;  %v1957_v34 = vpop.permute.xlu0 %1956 }
 0x62b   :  { %v2226_v22 = vpack.c.bf16 %v1693_v44, %v1692_v43  ;;  %v1663_v57 = vmul.f32 %v2575_v54, %v1631_v18  ;;  %v1601_v33 = vmul.f32 %v2577_v30, %v1527_v38  ;;  %2025 = vst.msk [vmem:[%s3953_s8 + $0xe0] sm:$0xff] %vm1996_vm2, %v1957_v34 }
 0x62d   :  { %2270 = vst [vmem:[#allocation5 + $0x40] sm:$0xff] %v2226_v22   ;;  %v1695_v16 = vmul.f32 %v1663_v57, %v3766_v23  ;;  %v1633_v12 = vsub.f32 2.0, %v1601_v33  ;;  %v2579_v23 = vpop.eup %2578  ;;  %v3960_v33 = vld [vmem:[#allocation9_spill] sm:$0xff] }
 0x62e   :  { %v1961_v52 = vpop.permute.xlu0 %1960  ;;  %v1602_v61 = vmul.f32 %v2579_v23, %v3851_v31  ;;  %v2581_v6 = vpop.eup %2580 }
 0x62f   :  { %v2231_v14 = vpack.c.bf16 %v1695_v16, %v1694_v26  ;;  %v1665_v55 = vmul.f32 %v2577_v30, %v1633_v12  ;;  %2027 = vst.msk [vmem:[%s3953_s8 + $0xf0] sm:$0xff] %vm1996_vm2, %v1961_v52  ;;  %v1604_v45 = vmul.f32 %v2581_v6, %v3857_v48  ;;  %v2583_v63 = vpop.eup %2582 }
 0x630   :  { %v1606_v21 = vmul.f32 %v2583_v63, %v3865_v39 }
 0x631   :  { %2271 = vst [vmem:[#allocation5 + $0x48] sm:$0xff] %v2231_v14   ;;  %v1697_v20 = vmul.f32 %v1665_v55, %v3776_v36  ;;  %v1634_v36 = vsub.f32 2.0, %v1602_v61  ;;  %v1636_v4 = vsub.f32 2.0, %v1604_v45 }
 0x632   :  { %v1638_v48 = vsub.f32 2.0, %v1606_v21 }
 0x633   :  { %v2236_v51 = vpack.c.bf16 %v1697_v20, %v1696_v50  ;;  %v1666_v47 = vmul.f32 %v2579_v23, %v1634_v36  ;;  %v1668_v15 = vmul.f32 %v2581_v6, %v1636_v4  ;;  %v3961_v20 = vld [vmem:[#allocation8_spill] sm:$0xff] }
 0x635   :  { %2272 = vst [vmem:[#allocation5 + $0x50] sm:$0xff] %v2236_v51   ;;  %v1698_v29 = vmul.f32 %v1666_v47, %v3736_v35  ;;  %v1700_v49 = vmul.f32 %v1668_v15, %v3747_v7  ;;  %v1670_v35 = vmul.f32 %v2583_v63, %v1638_v48 }
 0x637   :  { %v1702_v44 = vmul.f32 %v1670_v35, %v3761_v25 }
 0x650   :  { %v1531_v58 = vpop.xlane.xlu1 %1530 }
 0x651   :  { %2584 = vrcp.f32 %v1531_v58 }
 0x652   :  { %2586 = vrcp.f32 %v3870_v41 }
 0x654   :  { %v1535_v11 = vpop.xlane.xlu1 %1534 }
 0x655   :  { %2588 = vrcp.f32 %v1535_v11 }
 0x658   :  { %v1539_v32 = vpop.xlane.xlu1 %1538 }
 0x659   :  { %2590 = vrcp.f32 %v1539_v32 }
 0x65b   :  { %v2585_v38 = vpop.eup %2584 }
 0x65c   :  { %v1603_v27 = vmul.f32 %v2585_v38, %v1531_v58  ;;  %v1543_v9 = vpop.xlane.xlu1 %1542  ;;  %v2587_v56 = vpop.eup %2586  ;;  %v3962_v58 = vld [vmem:[#allocation10_spill] sm:$0xff] }
 0x65d   :  { %2592 = vrcp.f32 %v1543_v9  ;;  %v1608_v2 = vmul.f32 %v2587_v56, %v3870_v41 }
 0x65e   :  { %v1635_v46 = vsub.f32 2.0, %v1603_v27  ;;  %2594 = vrcp.f32 %v3875_v28 }
 0x65f   :  { %v2589_v0 = vpop.eup %2588  ;;  %v1640_v19 = vsub.f32 2.0, %v1608_v2 }
 0x660   :  { %v1667_v31 = vmul.f32 %v2585_v38, %v1635_v46  ;;  %v1605_v59 = vmul.f32 %v2589_v0, %v1535_v11  ;;  %v1955_v13 = vpop.permute.xlu1 %1954 }
 0x661   :  { %2024 = vst.msk [vmem:[%s3953_s8 + $0xd8] sm:$0xff] %vm1996_vm2, %v1955_v13  ;;  %v1672_v18 = vmul.f32 %v2587_v56, %v1640_v19 }
 0x662   :  { %v1699_v3 = vmul.f32 %v1667_v31, %v3796_v42  ;;  %v1637_v1 = vsub.f32 2.0, %v1605_v59 }
 0x663   :  { %v2591_v39 = vpop.eup %2590  ;;  %v1704_v57 = vmul.f32 %v1672_v18, %v3771_v60 }
 0x664   :  { %v2241_v10 = vpack.c.bf16 %v1699_v3, %v1698_v29  ;;  %v1669_v8 = vmul.f32 %v2589_v0, %v1637_v1  ;;  %v1607_v54 = vmul.f32 %v2591_v39, %v1539_v32  ;;  %v1959_v24 = vpop.permute.xlu1 %1958 }
 0x665   :  { %2026 = vst.msk [vmem:[%s3953_s8 + $0xe8] sm:$0xff] %vm1996_vm2, %v1959_v24 }
 0x666   :  { %2273 = vst [vmem:[#allocation5 + $0x58] sm:$0xff] %v2241_v10   ;;  %v1701_v41 = vmul.f32 %v1669_v8, %v3805_v17  ;;  %v1639_v62 = vsub.f32 2.0, %v1607_v54 }
 0x667   :  { %v2593_v42 = vpop.eup %2592 }
 0x668   :  { %v2246_v43 = vpack.c.bf16 %v1701_v41, %v1700_v49  ;;  %v1671_v37 = vmul.f32 %v2591_v39, %v1639_v62  ;;  %v1609_v40 = vmul.f32 %v2593_v42, %v1543_v9  ;;  %v2595_v16 = vpop.eup %2594 }
 0x66a   :  { %2274 = vst [vmem:[#allocation5 + $0x60] sm:$0xff] %v2246_v43   ;;  %v1703_v7 = vmul.f32 %v1671_v37, %v3810_v53  ;;  %v1641_v30 = vsub.f32 2.0, %v1609_v40  ;;  %v1610_v53 = vmul.f32 %v2595_v16, %v3875_v28 }
 0x66c   :  { %v2251_v34 = vpack.c.bf16 %v1703_v7, %v1702_v44  ;;  %v1673_v22 = vmul.f32 %v2593_v42, %v1641_v30  ;;  %v1642_v12 = vsub.f32 2.0, %v1610_v53 }
 0x66e   :  { %2275 = vst [vmem:[#allocation5 + $0x68] sm:$0xff] %v2251_v34   ;;  %v1705_v26 = vmul.f32 %v1673_v22, %v3960_v33  ;;  %v1674_v14 = vmul.f32 %v2595_v16, %v1642_v12 }
 0x670   :  { %v2256_v17 = vpack.c.bf16 %v1705_v26, %v1704_v57  ;;  %v1706_v51 = vmul.f32 %v1674_v14, %v3961_v20 }
 0x672   :  { %2276 = vst [vmem:[#allocation5 + $0x70] sm:$0xff] %v2256_v17  }
 0x695   :  { %v1547_v5 = vpop.xlane.xlu1 %1546 }
 0x696   :  { %2596 = vrcp.f32 %v1547_v5 }
 0x699   :  { %v1963_v25 = vpop.permute.xlu1 %1962 }
 0x69a   :  { %2028 = vst.msk [vmem:[%s3953_s8 + $0xf8] sm:$0xff] %vm1996_vm2, %v1963_v25 }
 0x6a0   :  { %v2597_v60 = vpop.eup %2596 }
 0x6a1   :  { %v1611_v52 = vmul.f32 %v2597_v60, %v1547_v5 }
 0x6a3   :  { %v1643_v55 = vsub.f32 2.0, %v1611_v52 }
 0x6a5   :  { %v1675_v50 = vmul.f32 %v2597_v60, %v1643_v55 }
 0x6a7   :  { %v1707_v23 = vmul.f32 %v1675_v50, %v3962_v58 }
 0x6a9   :  { %v2261_v11 = vpack.c.bf16 %v1707_v23, %v1706_v51 }
 0x6ab   :  { %2277 = vst [vmem:[#allocation5 + $0x78] sm:$0xff] %v2261_v11  }
 0x6ac   :  { %2631 = shalt.err (!%p2628_p12)
}
 0x6ad   :  { %s2632_s18 = scalar_lea.hbm %s3952_s7, 2048 }
 0x6ae   :  { %p2633_p13 = scmp.ne.s32.totalorder %s3952_s7, %s2632_s18  ;;  %p2636_p0 = scmp.lt.u32.totalorder %s2632_s18, %s3952_s7 }
 0x6b0   :  { %p2638_p1 = pnand %p2636_p0, %p2633_p13 }
 0x6b2   :  { %2641 = shalt.err (!%p2638_p1)
}
 0x6b3   :  { %2040 = dma.vmem_to_hbm [thread:$0]  %s2035_s13, 2048, %s3952_s7, [#allocation4], %s2647_s15, %s2647_s15, %s2648_s16  }
 0x6b4   :  { %2644 = dma.done.wait [#allocation4], 2048  }
 0x6b5   :  { %2645 = vsyncadd [#allocation4], 4294965248 }
 0x6b6   :  { %2048 = vsyncpa [#allocation3], 1 }
 0x6b7   :  { %2049 = vsyncpa [#allocation4], 1 }

</bundles_post_ra>
